<compile_context>
chip_gen: v6e
topology: v6e:2x2x1
jax: 0.10.0
libtpu: 0.0.40
codegen_flags: <defaults>
</compile_context>

<pallas_src>
import math

import jax
import jax.numpy as jnp
from jax.experimental import pallas as pl
from jax.experimental.pallas import tpu as pltpu


def _round_up(x, m):
    return ((x + m - 1) // m) * m


def _is_multi_tensorcore():
    # v7x has 2 TensorCores per chip; v5e/v6e have 1.  Best effort detection,
    # falling back to the single-TC (max-tile) policy.
    try:
        kind = jax.devices()[0].device_kind.lower()
        return "v7" in kind
    except Exception:
        return False


def _pick_tm(M):
    if _is_multi_tensorcore() and M >= 16:
        # ensure >= 2 grid steps so both TensorCores get work.
        tm = max(8, _round_up(M // 2, 8))
        tm = min(tm, 256)
    else:
        # single TC: fewest, biggest blocks (per-step overhead dominates here).
        tm = 512 if (M >= 512 and M % 512 == 0) else min(512, _round_up(M, 8))
    return tm


# ----------------------------------------------------------------------------
# Pallas kernels
# ----------------------------------------------------------------------------

def matmul_bias_act_pallas(a, b, bias=None, leaky_slope=None):
    """(M,K) @ (K,N) [+ bias] [+ LeakyReLU] -> bf16 (M, Np), Np = round_up(N,128).

    M is tiled (pipelined "parallel" grid), B/bias stay resident, N is
    zero-padded to a multiple of 128 so stores are lane-dense full vst.
    Operands bf16, MXU accumulation + epilogue f32, output bf16 (lane padding
    is carried to the next stage, not sliced back).
    """
    M, K = a.shape
    N = b.shape[1]
    Np = _round_up(N, 128)
    tm = _pick_tm(M)
    Mp = _round_up(M, tm)

    a_p = a if Mp == M else jnp.pad(a, ((0, Mp - M), (0, 0)))
    a_p = a_p.astype(jnp.bfloat16)
    b_p = jnp.pad(b.astype(jnp.float32), ((0, 0), (0, Np - N))).astype(jnp.bfloat16)

    slope = leaky_slope
    has_bias = bias is not None

    if has_bias:
        bias_p = jnp.pad(bias.astype(jnp.float32), (0, Np - N)).reshape(1, Np)

        def kernel(a_ref, b_ref, bias_ref, o_ref):
            acc = jnp.dot(a_ref[...], b_ref[...],
                          preferred_element_type=jnp.float32)
            acc = acc + bias_ref[...]
            if slope is not None:
                acc = jnp.where(acc >= 0, acc, slope * acc)
            o_ref[...] = acc.astype(o_ref.dtype)

        operands = (a_p, b_p, bias_p)
        in_specs = [
            pl.BlockSpec((tm, K), lambda i: (i, 0)),
            pl.BlockSpec((K, Np), lambda i: (0, 0)),   # resident weights
            pl.BlockSpec((1, Np), lambda i: (0, 0)),   # resident bias
        ]
    else:
        def kernel(a_ref, b_ref, o_ref):
            acc = jnp.dot(a_ref[...], b_ref[...],
                          preferred_element_type=jnp.float32)
            if slope is not None:
                acc = jnp.where(acc >= 0, acc, slope * acc)
            o_ref[...] = acc.astype(o_ref.dtype)

        operands = (a_p, b_p)
        in_specs = [
            pl.BlockSpec((tm, K), lambda i: (i, 0)),
            pl.BlockSpec((K, Np), lambda i: (0, 0)),
        ]

    out = pl.pallas_call(
        kernel,
        out_shape=jax.ShapeDtypeStruct((Mp, Np), jnp.bfloat16),
        grid=(Mp // tm,),
        in_specs=in_specs,
        out_specs=pl.BlockSpec((tm, Np), lambda i: (i, 0)),
        compiler_params=pltpu.CompilerParams(
            dimension_semantics=("parallel",)),
    )(*operands)
    if Mp != M:
        out = out[:M]
    return out                                     # (M, Np), lane padding kept


def _group_onehot(c_pad, c_real, groups):
    """(c_pad, groups) one-hot group map; rows for padded channels are zero."""
    cg = c_real // groups
    ch = jnp.arange(c_pad)
    return ((ch[:, None] // cg == jnp.arange(groups)[None, :]) &
            (ch[:, None] < c_real)).astype(jnp.float32)


def group_norm_attention_pallas(x, groups, c_real, wq, wk, wv, wo, gamma,
                                eps=1e-5, leaky_slope=0.2):
    """Fused GroupNormUnscaled + LeakyReLU + residual self-attention.

    x: (N, H, W, Cp) bf16, channels lane-padded to Cp (real channels = c_real,
    padded lanes are exactly 0).  One grid step per sample; GN stats via tiny
    matmuls against a one-hot group map (no in-kernel reshape/transpose).
    """
    # TODO(synk): AdditiveMultiheadAttention2d source is not available; this
    # implements SAGAN-style residual self-attention (1 head, key dim C//8).
    N, H, W, Cp = x.shape
    L = H * W
    cg = c_real // groups
    dk = wq.shape[1]
    dkp = _round_up(dk, 128)
    scale = 1.0 / math.sqrt(dk)

    gmat = _group_onehot(Cp, c_real, groups)               # (Cp, groups)
    inv_count = 1.0 / float(L * cg)
    slope = leaky_slope

    def pad_w(w, rows, cols):
        return jnp.pad(w.astype(jnp.float32),
                       ((0, rows - w.shape[0]), (0, cols - w.shape[1])))

    # Fold the score scale into wq and gamma into wo (weight side, once).
    wq_p = (pad_w(wq, Cp, dkp) * scale).astype(jnp.bfloat16)
    wk_p = pad_w(wk, Cp, dkp).astype(jnp.bfloat16)
    wv_p = pad_w(wv, Cp, Cp).astype(jnp.bfloat16)
    wo_p = (pad_w(wo, Cp, Cp) * gamma).astype(jnp.bfloat16)

    xr = x.reshape(N, L, Cp)                                # contiguous: free

    def kernel(x_ref, g_ref, wq_ref, wk_ref, wv_ref, wo_ref, o_ref):
        x2 = x_ref[...].astype(jnp.float32)                 # (L, Cp)
        G = g_ref[...]                                      # (Cp, groups)
        # --- GroupNormUnscaled + LeakyReLU ---
        s1 = jnp.sum(x2, axis=0, keepdims=True)             # (1, Cp)
        s2 = jnp.sum(x2 * x2, axis=0, keepdims=True)
        gm = jnp.dot(s1, G, preferred_element_type=jnp.float32) * inv_count
        gs = jnp.dot(s2, G, preferred_element_type=jnp.float32) * inv_count
        var = jnp.maximum(gs - gm * gm, 0.0)                # cancellation guard
        rstd = jax.lax.rsqrt(var + eps)                     # (1, groups)
        mean_c = jax.lax.dot_general(gm, G, (((1,), (1,)), ((), ())),
                                     preferred_element_type=jnp.float32)
        rstd_c = jax.lax.dot_general(rstd, G, (((1,), (1,)), ((), ())),
                                     preferred_element_type=jnp.float32)
        xn = (x2 - mean_c) * rstd_c
        xn = jnp.where(xn >= 0, xn, slope * xn)
        xnb = xn.astype(jnp.bfloat16)
        # --- residual self-attention ---
        q = jnp.dot(xnb, wq_ref[...], preferred_element_type=jnp.float32)
        k = jnp.dot(xnb, wk_ref[...], preferred_element_type=jnp.float32)
        v = jnp.dot(xnb, wv_ref[...], preferred_element_type=jnp.float32)
        # q @ k^T via dot_general (contract dim 1 of both) -> no k relayout.
        s = jax.lax.dot_general(q.astype(jnp.bfloat16), k.astype(jnp.bfloat16),
                                (((1,), (1,)), ((), ())),
                                preferred_element_type=jnp.float32)   # (L, L)
        s = s - jnp.max(s, axis=-1, keepdims=True)
        p = jnp.exp(s)
        inv = pl.reciprocal(jnp.sum(p, axis=-1, keepdims=True), approx=True)
        p = p * inv
        o = jnp.dot(p.astype(jnp.bfloat16), v.astype(jnp.bfloat16),
                    preferred_element_type=jnp.float32)
        y = jnp.dot(o.astype(jnp.bfloat16), wo_ref[...],
                    preferred_element_type=jnp.float32)
        o_ref[...] = (xn + y).astype(o_ref.dtype)           # gamma folded in wo

    out = pl.pallas_call(
        kernel,
        out_shape=jax.ShapeDtypeStruct((N, L, Cp), jnp.bfloat16),
        grid=(N,),
        in_specs=[
            pl.BlockSpec((pl.Squeezed(), L, Cp), lambda n: (n, 0, 0)),
            pl.BlockSpec((Cp, groups), lambda n: (0, 0)),
            pl.BlockSpec((Cp, dkp), lambda n: (0, 0)),
            pl.BlockSpec((Cp, dkp), lambda n: (0, 0)),
            pl.BlockSpec((Cp, Cp), lambda n: (0, 0)),
            pl.BlockSpec((Cp, Cp), lambda n: (0, 0)),
        ],
        out_specs=pl.BlockSpec((pl.Squeezed(), L, Cp), lambda n: (n, 0, 0)),
        compiler_params=pltpu.CompilerParams(
            dimension_semantics=("parallel",)),
    )(xr, gmat, wq_p, wk_p, wv_p, wo_p)
    return out.reshape(N, H, W, Cp)


def group_norm_conv_out_pallas(x, groups, c_real, w_oihw,
                               eps=1e-5, leaky_slope=0.2):
    """Fused GroupNormUnscaled + LeakyReLU + final 4x4 valid conv to 1 channel.

    The last conv's receptive field is the entire HxW map, so per sample it is
    a single weighted full-reduction; we emit per-channel partial sums (1, Cp)
    lane-dense and finish the length-128 reduction in plain JAX (tiny).
    Returns (N,) f32 logits.
    """
    N, H, W, Cp = x.shape
    HW = H * W
    cg = c_real // groups
    gmat = _group_onehot(Cp, c_real, groups)                # (Cp, groups)
    inv_count = 1.0 / float(HW * cg)
    slope = leaky_slope

    # w4 (1, Cin, kh, kw) laid out to match the (HW, Cp) activation block.
    w_hw_c = jnp.transpose(w_oihw[0], (1, 2, 0)).reshape(HW, c_real)
    w_hw_c = jnp.pad(w_hw_c.astype(jnp.float32), ((0, 0), (0, Cp - c_real)))

    xr = x.reshape(N, HW, Cp)

    def kernel(x_ref, g_ref, w_ref, o_ref):
        x2 = x_ref[...].astype(jnp.float32)                 # (HW, Cp)
        G = g_ref[...]
        s1 = jnp.sum(x2, axis=0, keepdims=True)
        s2 = jnp.sum(x2 * x2, axis=0, keepdims=True)
        gm = jnp.dot(s1, G, preferred_element_type=jnp.float32) * inv_count
        gs = jnp.dot(s2, G, preferred_element_type=jnp.float32) * inv_count
        var = jnp.maximum(gs - gm * gm, 0.0)
        rstd = jax.lax.rsqrt(var + eps)
        mean_c = jax.lax.dot_general(gm, G, (((1,), (1,)), ((), ())),
                                     preferred_element_type=jnp.float32)
        rstd_c = jax.lax.dot_general(rstd, G, (((1,), (1,)), ((), ())),
                                     preferred_element_type=jnp.float32)
        xn = (x2 - mean_c) * rstd_c
        xn = jnp.where(xn >= 0, xn, slope * xn)
        # final conv (whole-map weighted reduce): per-channel partial sums.
        o_ref[...] = jnp.sum(xn * w_ref[...], axis=0, keepdims=True)   # (1, Cp)

    out = pl.pallas_call(
        kernel,
        out_shape=jax.ShapeDtypeStruct((N, 1, Cp), jnp.float32),
        grid=(N,),
        in_specs=[
            pl.BlockSpec((pl.Squeezed(), HW, Cp), lambda n: (n, 0, 0)),
            pl.BlockSpec((Cp, groups), lambda n: (0, 0)),
            pl.BlockSpec((HW, Cp), lambda n: (0, 0)),
        ],
        out_specs=pl.BlockSpec((pl.Squeezed(), 1, Cp), lambda n: (n, 0, 0)),
        compiler_params=pltpu.CompilerParams(
            dimension_semantics=("parallel",)),
    )(xr, gmat, w_hw_c)
    return jnp.sum(out[:, 0, :], axis=-1)                   # (N,) logits


# ----------------------------------------------------------------------------
# Plain-JAX glue (NHWC im2col, wrappers, parameter setup)
# ----------------------------------------------------------------------------

def conv2d_pallas(x, w_oihw, b=None, stride=1, pad=0, leaky_slope=None):
    """NHWC conv as im2col + fused-epilogue Pallas GEMM.

    x may carry lane-padded channels; the im2col taps slice only the real
    input channels (the padded lanes are exactly 0 anyway), so the patch
    matrix's K dimension stays compact (16*Cin, lane-aligned here).  The GEMM
    output keeps its 128-lane output-channel padding for the next stage.
    """
    N, H, W, _ = x.shape
    O, Cin, kh, kw = w_oihw.shape
    Ho = (H + 2 * pad - kh) // stride + 1
    Wo = (W + 2 * pad - kw) // stride + 1
    xr = x[..., :Cin]                                   # drop lane padding
    xp = jnp.pad(xr, ((0, 0), (pad, pad), (pad, pad), (0, 0)))
    taps = []
    for i in range(kh):
        for j in range(kw):
            taps.append(xp[:, i:i + stride * (Ho - 1) + 1:stride,
                              j:j + stride * (Wo - 1) + 1:stride, :])
    patches = jnp.concatenate(taps, axis=-1).reshape(N * Ho * Wo, kh * kw * Cin)
    wmat = jnp.transpose(w_oihw, (2, 3, 1, 0)).reshape(kh * kw * Cin, O)
    out = matmul_bias_act_pallas(patches.astype(jnp.bfloat16), wmat, b,
                                 leaky_slope)           # (M, Np) bf16
    return out.reshape(N, Ho, Wo, out.shape[1])


def spectral_normalize(w, iters=30):
    # TODO(synk): torch spectral_norm does 1 power iteration per forward with
    # persistent u/v; here we approximate sigma once at init.
    wm = w.reshape(w.shape[0], -1)
    v = jnp.ones((wm.shape[1],), jnp.float32)
    v = v / jnp.linalg.norm(v)
    u = wm @ v
    for _ in range(iters):
        u = wm @ v
        u = u / (jnp.linalg.norm(u) + 1e-12)
        v = wm.T @ u
        v = v / (jnp.linalg.norm(v) + 1e-12)
    sigma = u @ (wm @ v)
    return w / sigma


def kaiming_uniform(key, shape, fan_in, a=1.0):
    bound = math.sqrt(6.0 / ((1 + a * a) * fan_in))
    return jax.random.uniform(key, shape, jnp.float32, -bound, bound)


def init_params(key, nc, nf):
    ks = jax.random.split(key, 8)
    c_attn = nf * 2
    d_k = max(c_attn // 8, 1)
    p = {}
    # spectral_init(Conv2d(nc*2, nf, 4, 2, 1))
    p["w1"] = spectral_normalize(
        kaiming_uniform(ks[0], (nf, nc * 2, 4, 4), nc * 2 * 16))
    p["b1"] = jnp.zeros((nf,), jnp.float32)
    # spectral_init(Conv2d(nf, nf*2, 4, 2, 1, bias=False))
    p["w2"] = spectral_normalize(
        kaiming_uniform(ks[1], (nf * 2, nf, 4, 4), nf * 16))
    # AdditiveMultiheadAttention2d(nf*2, 1, nf*2//8)
    p["wq"] = kaiming_uniform(ks[2], (c_attn, d_k), c_attn)
    p["wk"] = kaiming_uniform(ks[3], (c_attn, d_k), c_attn)
    p["wv"] = kaiming_uniform(ks[4], (c_attn, c_attn), c_attn)
    p["wo"] = kaiming_uniform(ks[5], (c_attn, c_attn), c_attn)
    p["gamma"] = jnp.float32(1.0)
    # spectral_init(Conv2d(nf*2, nf*4, 4, 2, 1, bias=False))
    p["w3"] = spectral_normalize(
        kaiming_uniform(ks[6], (nf * 4, nf * 2, 4, 4), nf * 2 * 16))
    # spectral_init(Conv2d(nf*4, 1, 4, 1, 0, bias=False))
    p["w4"] = spectral_normalize(
        kaiming_uniform(ks[7], (1, nf * 4, 4, 4), nf * 4 * 16))
    return p


def gan_cmp_d_forward(left, right, params):
    nf = params["w1"].shape[0]
    # comb = cat([cat([left,right],1), cat([right,left],1)], 0)   (NCHW inputs)
    comb = jnp.concatenate(
        [jnp.concatenate([left, right], axis=1),
         jnp.concatenate([right, left], axis=1)], axis=0)
    h = jnp.transpose(comb, (0, 2, 3, 1)).astype(jnp.bfloat16)   # NHWC + bf16 once

    h = conv2d_pallas(h, params["w1"], params["b1"],
                      stride=2, pad=1, leaky_slope=0.2)    # conv1 + LeakyReLU
    h = conv2d_pallas(h, params["w2"], None, stride=2, pad=1)   # conv2 (no bias)
    h = group_norm_attention_pallas(                       # GN(4)+LReLU+attention
        h, groups=4, c_real=nf * 2,
        wq=params["wq"], wk=params["wk"], wv=params["wv"],
        wo=params["wo"], gamma=params["gamma"])
    h = conv2d_pallas(h, params["w3"], None, stride=2, pad=1)   # conv3 (no bias)
    flat = group_norm_conv_out_pallas(                     # GN(8)+LReLU+conv4
        h, groups=8, c_real=nf * 4, w_oihw=params["w4"])   # -> (2*B,)

    half = flat.shape[0] // 2
    cmp_a, cmp_b = flat[:half], flat[half:]
    return 0.5 * (cmp_a - cmp_b)


if __name__ == "__main__":
    nc, nf = 4, 8
    B, H, W = 2, 32, 32   # 32x32 so the final 4x4 valid conv yields a 1x1 map

    key = jax.random.PRNGKey(0)
    k_left, k_right, k_params = jax.random.split(key, 3)
    left = jax.random.normal(k_left, (B, nc, H, W), jnp.float32)
    right = jax.random.normal(k_right, (B, nc, H, W), jnp.float32)

    params = init_params(k_params, nc, nf)

    fwd = jax.jit(gan_cmp_d_forward)
    out = fwd(left, right, params)
    out = jax.block_until_ready(out)
    assert out.shape == (B,), out.shape
    assert jnp.all(jnp.isfinite(out))
    print("KERNEL_OK")
</pallas_src>

<mosaic_0001>
module attributes {stable_mosaic.version = 11 : i64} {
  func.func @kernel(%arg0: i32, %arg1: memref<512x128xbf16, #tpu.memory_space<vmem>>, %arg2: memref<128x128xbf16, #tpu.memory_space<vmem>>, %arg3: memref<1x128xf32, #tpu.memory_space<vmem>>, %arg4: memref<512x128xbf16, #tpu.memory_space<vmem>>) attributes {dimension_semantics = [#tpu.dimension_semantics<parallel>], iteration_bounds = array<i64: 2>, scalar_prefetch = 0 : i64, scratch_operands = 0 : i64, tpu.core_type = #tpu.core_type<tc>, window_params = [{transform_indices = @transform_0, window_bounds = array<i64: 512, 128>}, {pipeline_mode = #tpu.pipeline_mode<synchronous>, transform_indices = @transform_1, window_bounds = array<i64: 128, 128>}, {pipeline_mode = #tpu.pipeline_mode<synchronous>, transform_indices = @transform_2, window_bounds = array<i64: 1, 128>}, {transform_indices = @transform_3, window_bounds = array<i64: 512, 128>}]} {
    %c0 = arith.constant 0 : index
    %c0_0 = arith.constant 0 : index
    %0 = vector.load %arg1[%c0, %c0_0] : memref<512x128xbf16, #tpu.memory_space<vmem>>, vector<512x128xbf16>
    %c0_1 = arith.constant 0 : index
    %c0_2 = arith.constant 0 : index
    %1 = vector.load %arg2[%c0_1, %c0_2] : memref<128x128xbf16, #tpu.memory_space<vmem>>, vector<128x128xbf16>
    %cst = arith.constant dense<0.000000e+00> : vector<512x128xf32>
    %2 = tpu.matmul %0, %1, %cst {dimension_numbers = #tpu.dot_dimension_numbers<[1], [0], [0], [1], [0, 0, 1, 1], [], []>} : vector<512x128xbf16>, vector<128x128xbf16>, vector<512x128xf32> -> vector<512x128xf32>
    %c0_3 = arith.constant 0 : index
    %c0_4 = arith.constant 0 : index
    %3 = vector.load %arg3[%c0_3, %c0_4] : memref<1x128xf32, #tpu.memory_space<vmem>>, vector<1x128xf32>
    %4 = vector.broadcast %3 : vector<1x128xf32> to vector<512x128xf32>
    %5 = arith.addf %2, %4 : vector<512x128xf32>
    %cst_5 = arith.constant 0.000000e+00 : f32
    %6 = vector.broadcast %cst_5 : f32 to vector<512x128xf32>
    %7 = arith.cmpf oge, %5, %6 : vector<512x128xf32>
    %cst_6 = arith.constant 2.000000e-01 : f32
    %8 = vector.broadcast %cst_6 : f32 to vector<512x128xf32>
    %9 = arith.mulf %8, %5 : vector<512x128xf32>
    %10 = arith.select %7, %5, %9 : vector<512x128xi1>, vector<512x128xf32>
    %11 = arith.truncf %10 : vector<512x128xf32> to vector<512x128xbf16>
    %c0_7 = arith.constant 0 : index
    %c0_8 = arith.constant 0 : index
    %12 = vector.load %arg4[%c0_7, %c0_8] : memref<512x128xbf16, #tpu.memory_space<vmem>>, vector<512x128xbf16>
    tpu.vector_store %arg4[%c0_7, %c0_8], %11 {strides = array<i32>} : memref<512x128xbf16, #tpu.memory_space<vmem>>, vector<512x128xbf16>,
    return
  }
  func.func @transform_0(%arg0: i32) -> (i32, i32) {
    %c0_i32 = arith.constant 0 : i32
    %c0_i32_0 = arith.constant 0 : i32
    return %arg0, %c0_i32 : i32, i32
  }
  func.func @transform_1(%arg0: i32) -> (i32, i32) {
    %c0_i32 = arith.constant 0 : i32
    %c0_i32_0 = arith.constant 0 : i32
    %c0_i32_1 = arith.constant 0 : i32
    return %c0_i32, %c0_i32_0 : i32, i32
  }
  func.func @transform_2(%arg0: i32) -> (i32, i32) {
    %c0_i32 = arith.constant 0 : i32
    %c0_i32_0 = arith.constant 0 : i32
    %c0_i32_1 = arith.constant 0 : i32
    return %c0_i32, %c0_i32_0 : i32, i32
  }
  func.func @transform_3(%arg0: i32) -> (i32, i32) {
    %c0_i32 = arith.constant 0 : i32
    %c0_i32_0 = arith.constant 0 : i32
    return %arg0, %c0_i32 : i32, i32
  }
}

module attributes {stable_mosaic.version = 11 : i64} {
  func.func @kernel(%arg0: i32, %arg1: memref<256x128xbf16, #tpu.memory_space<vmem>>, %arg2: memref<128x128xbf16, #tpu.memory_space<vmem>>, %arg3: memref<256x128xbf16, #tpu.memory_space<vmem>>) attributes {dimension_semantics = [#tpu.dimension_semantics<parallel>], iteration_bounds = array<i64: 1>, scalar_prefetch = 0 : i64, scratch_operands = 0 : i64, tpu.core_type = #tpu.core_type<tc>, window_params = [{transform_indices = @transform_0, window_bounds = array<i64: 256, 128>}, {pipeline_mode = #tpu.pipeline_mode<synchronous>, transform_indices = @transform_1, window_bounds = array<i64: 128, 128>}, {transform_indices = @transform_2, window_bounds = array<i64: 256, 128>}]} {
    %c0 = arith.constant 0 : index
    %c0_0 = arith.constant 0 : index
    %0 = vector.load %arg1[%c0, %c0_0] : memref<256x128xbf16, #tpu.memory_space<vmem>>, vector<256x128xbf16>
    %c0_1 = arith.constant 0 : index
    %c0_2 = arith.constant 0 : index
    %1 = vector.load %arg2[%c0_1, %c0_2] : memref<128x128xbf16, #tpu.memory_space<vmem>>, vector<128x128xbf16>
    %cst = arith.constant dense<0.000000e+00> : vector<256x128xf32>
    %2 = tpu.matmul %0, %1, %cst {dimension_numbers = #tpu.dot_dimension_numbers<[1], [0], [0], [1], [0, 0, 1, 1], [], []>} : vector<256x128xbf16>, vector<128x128xbf16>, vector<256x128xf32> -> vector<256x128xf32>
    %3 = arith.truncf %2 : vector<256x128xf32> to vector<256x128xbf16>
    %c0_3 = arith.constant 0 : index
    %c0_4 = arith.constant 0 : index
    %4 = vector.load %arg3[%c0_3, %c0_4] : memref<256x128xbf16, #tpu.memory_space<vmem>>, vector<256x128xbf16>
    tpu.vector_store %arg3[%c0_3, %c0_4], %3 {strides = array<i32>} : memref<256x128xbf16, #tpu.memory_space<vmem>>, vector<256x128xbf16>,
    return
  }
  func.func @transform_0(%arg0: i32) -> (i32, i32) {
    %c0_i32 = arith.constant 0 : i32
    %c0_i32_0 = arith.constant 0 : i32
    return %arg0, %c0_i32 : i32, i32
  }
  func.func @transform_1(%arg0: i32) -> (i32, i32) {
    %c0_i32 = arith.constant 0 : i32
    %c0_i32_0 = arith.constant 0 : i32
    %c0_i32_1 = arith.constant 0 : i32
    return %c0_i32, %c0_i32_0 : i32, i32
  }
  func.func @transform_2(%arg0: i32) -> (i32, i32) {
    %c0_i32 = arith.constant 0 : i32
    %c0_i32_0 = arith.constant 0 : i32
    return %arg0, %c0_i32 : i32, i32
  }
}

module attributes {stable_mosaic.version = 11 : i64} {
  func.func @kernel(%arg0: i32, %arg1: memref<1x64x128xbf16, #tpu.memory_space<vmem>>, %arg2: memref<128x4xf32, #tpu.memory_space<vmem>>, %arg3: memref<128x128xbf16, #tpu.memory_space<vmem>>, %arg4: memref<128x128xbf16, #tpu.memory_space<vmem>>, %arg5: memref<128x128xbf16, #tpu.memory_space<vmem>>, %arg6: memref<128x128xbf16, #tpu.memory_space<vmem>>, %arg7: memref<1x64x128xbf16, #tpu.memory_space<vmem>>) attributes {dimension_semantics = [#tpu.dimension_semantics<parallel>], iteration_bounds = array<i64: 4>, scalar_prefetch = 0 : i64, scratch_operands = 0 : i64, tpu.core_type = #tpu.core_type<tc>, window_params = [{transform_indices = @transform_0, window_bounds = array<i64: 1, 64, 128>}, {pipeline_mode = #tpu.pipeline_mode<synchronous>, transform_indices = @transform_1, window_bounds = array<i64: 128, 4>}, {pipeline_mode = #tpu.pipeline_mode<synchronous>, transform_indices = @transform_2, window_bounds = array<i64: 128, 128>}, {pipeline_mode = #tpu.pipeline_mode<synchronous>, transform_indices = @transform_3, window_bounds = array<i64: 128, 128>}, {pipeline_mode = #tpu.pipeline_mode<synchronous>, transform_indices = @transform_4, window_bounds = array<i64: 128, 128>}, {pipeline_mode = #tpu.pipeline_mode<synchronous>, transform_indices = @transform_5, window_bounds = array<i64: 128, 128>}, {transform_indices = @transform_6, window_bounds = array<i64: 1, 64, 128>}]} {
    %c0 = arith.constant 0 : index
    %c0_0 = arith.constant 0 : index
    %c0_1 = arith.constant 0 : index
    %0 = vector.load %arg1[%c0, %c0_0, %c0_1] : memref<1x64x128xbf16, #tpu.memory_space<vmem>>, vector<1x64x128xbf16>
    %1 = vector.shape_cast %0 : vector<1x64x128xbf16> to vector<64x128xbf16>
    %2 = arith.extf %1 : vector<64x128xbf16> to vector<64x128xf32>
    %c0_2 = arith.constant 0 : index
    %c0_3 = arith.constant 0 : index
    %3 = vector.load %arg2[%c0_2, %c0_3] : memref<128x4xf32, #tpu.memory_space<vmem>>, vector<128x4xf32>
    %cst = arith.constant dense<0.000000e+00> : vector<128xf32>
    %4 = vector.multi_reduction <add>, %2, %cst [0] : vector<64x128xf32> to vector<128xf32>
    %5 = vector.shape_cast %4 : vector<128xf32> to vector<1x128xf32>
    %6 = arith.mulf %2, %2 : vector<64x128xf32>
    %cst_4 = arith.constant dense<0.000000e+00> : vector<128xf32>
    %7 = vector.multi_reduction <add>, %6, %cst_4 [0] : vector<64x128xf32> to vector<128xf32>
    %8 = vector.shape_cast %7 : vector<128xf32> to vector<1x128xf32>
    %cst_5 = arith.constant dense<0.000000e+00> : vector<1x4xf32>
    %9 = tpu.matmul %5, %3, %cst_5 {dimension_numbers = #tpu.dot_dimension_numbers<[1], [0], [0], [1], [0, 0, 1, 1], [], []>} : vector<1x128xf32>, vector<128x4xf32>, vector<1x4xf32> -> vector<1x4xf32>
    %cst_6 = arith.constant 3.906250e-03 : f32
    %10 = vector.broadcast %cst_6 : f32 to vector<1x4xf32>
    %11 = arith.mulf %9, %10 : vector<1x4xf32>
    %cst_7 = arith.constant dense<0.000000e+00> : vector<1x4xf32>
    %12 = tpu.matmul %8, %3, %cst_7 {dimension_numbers = #tpu.dot_dimension_numbers<[1], [0], [0], [1], [0, 0, 1, 1], [], []>} : vector<1x128xf32>, vector<128x4xf32>, vector<1x4xf32> -> vector<1x4xf32>
    %cst_8 = arith.constant 3.906250e-03 : f32
    %13 = vector.broadcast %cst_8 : f32 to vector<1x4xf32>
    %14 = arith.mulf %12, %13 : vector<1x4xf32>
    %15 = arith.mulf %11, %11 : vector<1x4xf32>
    %16 = arith.subf %14, %15 : vector<1x4xf32>
    %cst_9 = arith.constant 0.000000e+00 : f32
    %17 = vector.broadcast %cst_9 : f32 to vector<1x4xf32>
    %18 = arith.maximumf %16, %17 : vector<1x4xf32>
    %cst_10 = arith.constant 9.99999974E-6 : f32
    %19 = vector.broadcast %cst_10 : f32 to vector<1x4xf32>
    %20 = arith.addf %18, %19 : vector<1x4xf32>
    %21 = math.rsqrt %20 : vector<1x4xf32>
    %cst_11 = arith.constant dense<0.000000e+00> : vector<1x128xf32>
    %22 = tpu.matmul %11, %3, %cst_11 {dimension_numbers = #tpu.dot_dimension_numbers<[1], [1], [0], [0], [0, 0, 1, 0], [], []>} : vector<1x4xf32>, vector<128x4xf32>, vector<1x128xf32> -> vector<1x128xf32>
    %cst_12 = arith.constant dense<0.000000e+00> : vector<1x128xf32>
    %23 = tpu.matmul %21, %3, %cst_12 {dimension_numbers = #tpu.dot_dimension_numbers<[1], [1], [0], [0], [0, 0, 1, 0], [], []>} : vector<1x4xf32>, vector<128x4xf32>, vector<1x128xf32> -> vector<1x128xf32>
    %24 = vector.broadcast %22 : vector<1x128xf32> to vector<64x128xf32>
    %25 = arith.subf %2, %24 : vector<64x128xf32>
    %26 = vector.broadcast %23 : vector<1x128xf32> to vector<64x128xf32>
    %27 = arith.mulf %25, %26 : vector<64x128xf32>
    %cst_13 = arith.constant 0.000000e+00 : f32
    %28 = vector.broadcast %cst_13 : f32 to vector<64x128xf32>
    %29 = arith.cmpf oge, %27, %28 : vector<64x128xf32>
    %cst_14 = arith.constant 2.000000e-01 : f32
    %30 = vector.broadcast %cst_14 : f32 to vector<64x128xf32>
    %31 = arith.mulf %30, %27 : vector<64x128xf32>
    %32 = arith.select %29, %27, %31 : vector<64x128xi1>, vector<64x128xf32>
    %33 = arith.truncf %32 : vector<64x128xf32> to vector<64x128xbf16>
    %c0_15 = arith.constant 0 : index
    %c0_16 = arith.constant 0 : index
    %34 = vector.load %arg3[%c0_15, %c0_16] : memref<128x128xbf16, #tpu.memory_space<vmem>>, vector<128x128xbf16>
    %cst_17 = arith.constant dense<0.000000e+00> : vector<64x128xf32>
    %35 = tpu.matmul %33, %34, %cst_17 {dimension_numbers = #tpu.dot_dimension_numbers<[1], [0], [0], [1], [0, 0, 1, 1], [], []>} : vector<64x128xbf16>, vector<128x128xbf16>, vector<64x128xf32> -> vector<64x128xf32>
    %c0_18 = arith.constant 0 : index
    %c0_19 = arith.constant 0 : index
    %36 = vector.load %arg4[%c0_18, %c0_19] : memref<128x128xbf16, #tpu.memory_space<vmem>>, vector<128x128xbf16>
    %cst_20 = arith.constant dense<0.000000e+00> : vector<64x128xf32>
    %37 = tpu.matmul %33, %36, %cst_20 {dimension_numbers = #tpu.dot_dimension_numbers<[1], [0], [0], [1], [0, 0, 1, 1], [], []>} : vector<64x128xbf16>, vector<128x128xbf16>, vector<64x128xf32> -> vector<64x128xf32>
    %c0_21 = arith.constant 0 : index
    %c0_22 = arith.constant 0 : index
    %38 = vector.load %arg5[%c0_21, %c0_22] : memref<128x128xbf16, #tpu.memory_space<vmem>>, vector<128x128xbf16>
    %cst_23 = arith.constant dense<0.000000e+00> : vector<64x128xf32>
    %39 = tpu.matmul %33, %38, %cst_23 {dimension_numbers = #tpu.dot_dimension_numbers<[1], [0], [0], [1], [0, 0, 1, 1], [], []>} : vector<64x128xbf16>, vector<128x128xbf16>, vector<64x128xf32> -> vector<64x128xf32>
    %40 = arith.truncf %35 : vector<64x128xf32> to vector<64x128xbf16>
    %41 = arith.truncf %37 : vector<64x128xf32> to vector<64x128xbf16>
    %cst_24 = arith.constant dense<0.000000e+00> : vector<64x64xf32>
    %42 = tpu.matmul %40, %41, %cst_24 {dimension_numbers = #tpu.dot_dimension_numbers<[1], [1], [0], [0], [0, 0, 1, 0], [], []>} : vector<64x128xbf16>, vector<64x128xbf16>, vector<64x64xf32> -> vector<64x64xf32>
    %cst_25 = arith.constant dense<0xFF800000> : vector<64xf32>
    %43 = vector.multi_reduction <maximumf>, %42, %cst_25 [1] : vector<64x64xf32> to vector<64xf32>
    %44 = vector.shape_cast %43 : vector<64xf32> to vector<64x1xf32>
    %45 = vector.broadcast %44 : vector<64x1xf32> to vector<64x64xf32>
    %46 = arith.subf %42, %45 : vector<64x64xf32>
    %47 = math.exp %46 : vector<64x64xf32>
    %cst_26 = arith.constant dense<0.000000e+00> : vector<64xf32>
    %48 = vector.multi_reduction <add>, %47, %cst_26 [1] : vector<64x64xf32> to vector<64xf32>
    %49 = vector.shape_cast %48 : vector<64xf32> to vector<64x1xf32>
    %50 = tpu.reciprocal %49 {approx = true} : vector<64x1xf32> -> vector<64x1xf32>
    %51 = vector.broadcast %50 : vector<64x1xf32> to vector<64x64xf32>
    %52 = arith.mulf %47, %51 : vector<64x64xf32>
    %53 = arith.truncf %52 : vector<64x64xf32> to vector<64x64xbf16>
    %54 = arith.truncf %39 : vector<64x128xf32> to vector<64x128xbf16>
    %cst_27 = arith.constant dense<0.000000e+00> : vector<64x128xf32>
    %55 = tpu.matmul %53, %54, %cst_27 {dimension_numbers = #tpu.dot_dimension_numbers<[1], [0], [0], [1], [0, 0, 1, 1], [], []>} : vector<64x64xbf16>, vector<64x128xbf16>, vector<64x128xf32> -> vector<64x128xf32>
    %56 = arith.truncf %55 : vector<64x128xf32> to vector<64x128xbf16>
    %c0_28 = arith.constant 0 : index
    %c0_29 = arith.constant 0 : index
    %57 = vector.load %arg6[%c0_28, %c0_29] : memref<128x128xbf16, #tpu.memory_space<vmem>>, vector<128x128xbf16>
    %cst_30 = arith.constant dense<0.000000e+00> : vector<64x128xf32>
    %58 = tpu.matmul %56, %57, %cst_30 {dimension_numbers = #tpu.dot_dimension_numbers<[1], [0], [0], [1], [0, 0, 1, 1], [], []>} : vector<64x128xbf16>, vector<128x128xbf16>, vector<64x128xf32> -> vector<64x128xf32>
    %59 = arith.addf %32, %58 : vector<64x128xf32>
    %60 = arith.truncf %59 : vector<64x128xf32> to vector<64x128xbf16>
    %c0_31 = arith.constant 0 : index
    %c0_32 = arith.constant 0 : index
    %c0_33 = arith.constant 0 : index
    %61 = vector.load %arg7[%c0_31, %c0_32, %c0_33] : memref<1x64x128xbf16, #tpu.memory_space<vmem>>, vector<1x64x128xbf16>
    %62 = vector.shape_cast %61 : vector<1x64x128xbf16> to vector<64x128xbf16>
    %63 = vector.shape_cast %60 : vector<64x128xbf16> to vector<1x64x128xbf16>
    tpu.vector_store %arg7[%c0_31, %c0_32, %c0_33], %63 {strides = array<i32>} : memref<1x64x128xbf16, #tpu.memory_space<vmem>>, vector<1x64x128xbf16>,
    return
  }
  func.func @transform_0(%arg0: i32) -> (i32, i32, i32) {
    %c0_i32 = arith.constant 0 : i32
    %c0_i32_0 = arith.constant 0 : i32
    %c0_i32_1 = arith.constant 0 : i32
    return %arg0, %c0_i32, %c0_i32_0 : i32, i32, i32
  }
  func.func @transform_1(%arg0: i32) -> (i32, i32) {
    %c0_i32 = arith.constant 0 : i32
    %c0_i32_0 = arith.constant 0 : i32
    %c0_i32_1 = arith.constant 0 : i32
    return %c0_i32, %c0_i32_0 : i32, i32
  }
  func.func @transform_2(%arg0: i32) -> (i32, i32) {
    %c0_i32 = arith.constant 0 : i32
    %c0_i32_0 = arith.constant 0 : i32
    %c0_i32_1 = arith.constant 0 : i32
    return %c0_i32, %c0_i32_0 : i32, i32
  }
  func.func @transform_3(%arg0: i32) -> (i32, i32) {
    %c0_i32 = arith.constant 0 : i32
    %c0_i32_0 = arith.constant 0 : i32
    %c0_i32_1 = arith.constant 0 : i32
    return %c0_i32, %c0_i32_0 : i32, i32
  }
  func.func @transform_4(%arg0: i32) -> (i32, i32) {
    %c0_i32 = arith.constant 0 : i32
    %c0_i32_0 = arith.constant 0 : i32
    %c0_i32_1 = arith.constant 0 : i32
    return %c0_i32, %c0_i32_0 : i32, i32
  }
  func.func @transform_5(%arg0: i32) -> (i32, i32) {
    %c0_i32 = arith.constant 0 : i32
    %c0_i32_0 = arith.constant 0 : i32
    %c0_i32_1 = arith.constant 0 : i32
    return %c0_i32, %c0_i32_0 : i32, i32
  }
  func.func @transform_6(%arg0: i32) -> (i32, i32, i32) {
    %c0_i32 = arith.constant 0 : i32
    %c0_i32_0 = arith.constant 0 : i32
    %c0_i32_1 = arith.constant 0 : i32
    return %arg0, %c0_i32, %c0_i32_0 : i32, i32, i32
  }
}

module attributes {stable_mosaic.version = 11 : i64} {
  func.func @kernel(%arg0: i32, %arg1: memref<64x256xbf16, #tpu.memory_space<vmem>>, %arg2: memref<256x128xbf16, #tpu.memory_space<vmem>>, %arg3: memref<64x128xbf16, #tpu.memory_space<vmem>>) attributes {dimension_semantics = [#tpu.dimension_semantics<parallel>], iteration_bounds = array<i64: 1>, scalar_prefetch = 0 : i64, scratch_operands = 0 : i64, tpu.core_type = #tpu.core_type<tc>, window_params = [{transform_indices = @transform_0, window_bounds = array<i64: 64, 256>}, {pipeline_mode = #tpu.pipeline_mode<synchronous>, transform_indices = @transform_1, window_bounds = array<i64: 256, 128>}, {transform_indices = @transform_2, window_bounds = array<i64: 64, 128>}]} {
    %c0 = arith.constant 0 : index
    %c0_0 = arith.constant 0 : index
    %0 = vector.load %arg1[%c0, %c0_0] : memref<64x256xbf16, #tpu.memory_space<vmem>>, vector<64x256xbf16>
    %c0_1 = arith.constant 0 : index
    %c0_2 = arith.constant 0 : index
    %1 = vector.load %arg2[%c0_1, %c0_2] : memref<256x128xbf16, #tpu.memory_space<vmem>>, vector<256x128xbf16>
    %cst = arith.constant dense<0.000000e+00> : vector<64x128xf32>
    %2 = tpu.matmul %0, %1, %cst {dimension_numbers = #tpu.dot_dimension_numbers<[1], [0], [0], [1], [0, 0, 1, 1], [], []>} : vector<64x256xbf16>, vector<256x128xbf16>, vector<64x128xf32> -> vector<64x128xf32>
    %3 = arith.truncf %2 : vector<64x128xf32> to vector<64x128xbf16>
    %c0_3 = arith.constant 0 : index
    %c0_4 = arith.constant 0 : index
    %4 = vector.load %arg3[%c0_3, %c0_4] : memref<64x128xbf16, #tpu.memory_space<vmem>>, vector<64x128xbf16>
    tpu.vector_store %arg3[%c0_3, %c0_4], %3 {strides = array<i32>} : memref<64x128xbf16, #tpu.memory_space<vmem>>, vector<64x128xbf16>,
    return
  }
  func.func @transform_0(%arg0: i32) -> (i32, i32) {
    %c0_i32 = arith.constant 0 : i32
    %c0_i32_0 = arith.constant 0 : i32
    return %arg0, %c0_i32 : i32, i32
  }
  func.func @transform_1(%arg0: i32) -> (i32, i32) {
    %c0_i32 = arith.constant 0 : i32
    %c0_i32_0 = arith.constant 0 : i32
    %c0_i32_1 = arith.constant 0 : i32
    return %c0_i32, %c0_i32_0 : i32, i32
  }
  func.func @transform_2(%arg0: i32) -> (i32, i32) {
    %c0_i32 = arith.constant 0 : i32
    %c0_i32_0 = arith.constant 0 : i32
    return %arg0, %c0_i32 : i32, i32
  }
}

module attributes {stable_mosaic.version = 11 : i64} {
  func.func @kernel(%arg0: i32, %arg1: memref<1x16x128xbf16, #tpu.memory_space<vmem>>, %arg2: memref<128x8xf32, #tpu.memory_space<vmem>>, %arg3: memref<16x128xf32, #tpu.memory_space<vmem>>, %arg4: memref<1x1x128xf32, #tpu.memory_space<vmem>>) attributes {dimension_semantics = [#tpu.dimension_semantics<parallel>], iteration_bounds = array<i64: 4>, scalar_prefetch = 0 : i64, scratch_operands = 0 : i64, tpu.core_type = #tpu.core_type<tc>, window_params = [{transform_indices = @transform_0, window_bounds = array<i64: 1, 16, 128>}, {pipeline_mode = #tpu.pipeline_mode<synchronous>, transform_indices = @transform_1, window_bounds = array<i64: 128, 8>}, {pipeline_mode = #tpu.pipeline_mode<synchronous>, transform_indices = @transform_2, window_bounds = array<i64: 16, 128>}, {transform_indices = @transform_3, window_bounds = array<i64: 1, 1, 128>}]} {
    %c0 = arith.constant 0 : index
    %c0_0 = arith.constant 0 : index
    %c0_1 = arith.constant 0 : index
    %0 = vector.load %arg1[%c0, %c0_0, %c0_1] : memref<1x16x128xbf16, #tpu.memory_space<vmem>>, vector<1x16x128xbf16>
    %1 = vector.shape_cast %0 : vector<1x16x128xbf16> to vector<16x128xbf16>
    %2 = arith.extf %1 : vector<16x128xbf16> to vector<16x128xf32>
    %c0_2 = arith.constant 0 : index
    %c0_3 = arith.constant 0 : index
    %3 = vector.load %arg2[%c0_2, %c0_3] : memref<128x8xf32, #tpu.memory_space<vmem>>, vector<128x8xf32>
    %cst = arith.constant dense<0.000000e+00> : vector<128xf32>
    %4 = vector.multi_reduction <add>, %2, %cst [0] : vector<16x128xf32> to vector<128xf32>
    %5 = vector.shape_cast %4 : vector<128xf32> to vector<1x128xf32>
    %6 = arith.mulf %2, %2 : vector<16x128xf32>
    %cst_4 = arith.constant dense<0.000000e+00> : vector<128xf32>
    %7 = vector.multi_reduction <add>, %6, %cst_4 [0] : vector<16x128xf32> to vector<128xf32>
    %8 = vector.shape_cast %7 : vector<128xf32> to vector<1x128xf32>
    %cst_5 = arith.constant dense<0.000000e+00> : vector<1x8xf32>
    %9 = tpu.matmul %5, %3, %cst_5 {dimension_numbers = #tpu.dot_dimension_numbers<[1], [0], [0], [1], [0, 0, 1, 1], [], []>} : vector<1x128xf32>, vector<128x8xf32>, vector<1x8xf32> -> vector<1x8xf32>
    %cst_6 = arith.constant 1.562500e-02 : f32
    %10 = vector.broadcast %cst_6 : f32 to vector<1x8xf32>
    %11 = arith.mulf %9, %10 : vector<1x8xf32>
    %cst_7 = arith.constant dense<0.000000e+00> : vector<1x8xf32>
    %12 = tpu.matmul %8, %3, %cst_7 {dimension_numbers = #tpu.dot_dimension_numbers<[1], [0], [0], [1], [0, 0, 1, 1], [], []>} : vector<1x128xf32>, vector<128x8xf32>, vector<1x8xf32> -> vector<1x8xf32>
    %cst_8 = arith.constant 1.562500e-02 : f32
    %13 = vector.broadcast %cst_8 : f32 to vector<1x8xf32>
    %14 = arith.mulf %12, %13 : vector<1x8xf32>
    %15 = arith.mulf %11, %11 : vector<1x8xf32>
    %16 = arith.subf %14, %15 : vector<1x8xf32>
    %cst_9 = arith.constant 0.000000e+00 : f32
    %17 = vector.broadcast %cst_9 : f32 to vector<1x8xf32>
    %18 = arith.maximumf %16, %17 : vector<1x8xf32>
    %cst_10 = arith.constant 9.99999974E-6 : f32
    %19 = vector.broadcast %cst_10 : f32 to vector<1x8xf32>
    %20 = arith.addf %18, %19 : vector<1x8xf32>
    %21 = math.rsqrt %20 : vector<1x8xf32>
    %cst_11 = arith.constant dense<0.000000e+00> : vector<1x128xf32>
    %22 = tpu.matmul %11, %3, %cst_11 {dimension_numbers = #tpu.dot_dimension_numbers<[1], [1], [0], [0], [0, 0, 1, 0], [], []>} : vector<1x8xf32>, vector<128x8xf32>, vector<1x128xf32> -> vector<1x128xf32>
    %cst_12 = arith.constant dense<0.000000e+00> : vector<1x128xf32>
    %23 = tpu.matmul %21, %3, %cst_12 {dimension_numbers = #tpu.dot_dimension_numbers<[1], [1], [0], [0], [0, 0, 1, 0], [], []>} : vector<1x8xf32>, vector<128x8xf32>, vector<1x128xf32> -> vector<1x128xf32>
    %24 = vector.broadcast %22 : vector<1x128xf32> to vector<16x128xf32>
    %25 = arith.subf %2, %24 : vector<16x128xf32>
    %26 = vector.broadcast %23 : vector<1x128xf32> to vector<16x128xf32>
    %27 = arith.mulf %25, %26 : vector<16x128xf32>
    %cst_13 = arith.constant 0.000000e+00 : f32
    %28 = vector.broadcast %cst_13 : f32 to vector<16x128xf32>
    %29 = arith.cmpf oge, %27, %28 : vector<16x128xf32>
    %cst_14 = arith.constant 2.000000e-01 : f32
    %30 = vector.broadcast %cst_14 : f32 to vector<16x128xf32>
    %31 = arith.mulf %30, %27 : vector<16x128xf32>
    %32 = arith.select %29, %27, %31 : vector<16x128xi1>, vector<16x128xf32>
    %c0_15 = arith.constant 0 : index
    %c0_16 = arith.constant 0 : index
    %33 = vector.load %arg3[%c0_15, %c0_16] : memref<16x128xf32, #tpu.memory_space<vmem>>, vector<16x128xf32>
    %34 = arith.mulf %32, %33 : vector<16x128xf32>
    %cst_17 = arith.constant dense<0.000000e+00> : vector<128xf32>
    %35 = vector.multi_reduction <add>, %34, %cst_17 [0] : vector<16x128xf32> to vector<128xf32>
    %36 = vector.shape_cast %35 : vector<128xf32> to vector<1x128xf32>
    %c0_18 = arith.constant 0 : index
    %c0_19 = arith.constant 0 : index
    %c0_20 = arith.constant 0 : index
    %37 = vector.load %arg4[%c0_18, %c0_19, %c0_20] : memref<1x1x128xf32, #tpu.memory_space<vmem>>, vector<1x1x128xf32>
    %38 = vector.shape_cast %37 : vector<1x1x128xf32> to vector<1x128xf32>
    %39 = vector.shape_cast %36 : vector<1x128xf32> to vector<1x1x128xf32>
    tpu.vector_store %arg4[%c0_18, %c0_19, %c0_20], %39 {strides = array<i32>} : memref<1x1x128xf32, #tpu.memory_space<vmem>>, vector<1x1x128xf32>,
    return
  }
  func.func @transform_0(%arg0: i32) -> (i32, i32, i32) {
    %c0_i32 = arith.constant 0 : i32
    %c0_i32_0 = arith.constant 0 : i32
    %c0_i32_1 = arith.constant 0 : i32
    return %arg0, %c0_i32, %c0_i32_0 : i32, i32, i32
  }
  func.func @transform_1(%arg0: i32) -> (i32, i32) {
    %c0_i32 = arith.constant 0 : i32
    %c0_i32_0 = arith.constant 0 : i32
    %c0_i32_1 = arith.constant 0 : i32
    return %c0_i32, %c0_i32_0 : i32, i32
  }
  func.func @transform_2(%arg0: i32) -> (i32, i32) {
    %c0_i32 = arith.constant 0 : i32
    %c0_i32_0 = arith.constant 0 : i32
    %c0_i32_1 = arith.constant 0 : i32
    return %c0_i32, %c0_i32_0 : i32, i32
  }
  func.func @transform_3(%arg0: i32) -> (i32, i32, i32) {
    %c0_i32 = arith.constant 0 : i32
    %c0_i32_0 = arith.constant 0 : i32
    %c0_i32_1 = arith.constant 0 : i32
    return %arg0, %c0_i32, %c0_i32_0 : i32, i32, i32
  }
}

</mosaic_0001>

<bundles_post_ra>
// kernel: gan_cmp_d_forward.5
= control target key start
LH: loop header
LB: loop body
LE: loop exit
PB: predicated region body
PF: predicated region fallthrough
CT: control target
= control target key end

     0   :  { %s1942_s12 = smov 0   ;;  %s2130_s0 = inlined_call_operand.vmem [shape: bf16[1024,128], index: 0, kind: input, shape index: {}]   ;;  %s2131_s1 = inlined_call_operand.vmem [shape: bf16[128,128], index: 1, kind: input, shape index: {}]   ;;  %s2132_s2 = inlined_call_operand.vmem [shape: f32[1,128], index: 2, kind: input, shape index: {}]   ;;  %s2133_s3 = inlined_call_operand.vmem [shape: bf16[1024,128], index: 3, kind: output, shape index: {}]  }
   0x1 LB: > { %s1359_s13 = sadd.s32 4294967295, %s1920_s12   ;;  %p1363_p0 = scmp.ge.s32.totalorder %s1920_s12, 1  ;;  %s1920_s12 = sphi %s1942_s12, %s13_s12  }
   0x2   : > { %p138_p1 = scmp.lt.s32.totalorder %s1920_s12, 3 }
   0x4   : > { %p139_p2 = pnand %p1363_p0, %p138_p1 }
   0x5   : > { %s1364_s16 = sshll.u32 (!%p139_p2), %s1359_s13, 6 }
   0x6   : > { %142 = sbr.rel (%p139_p2) target bundleno = 314 (0x13a), region = 32  ;;  %p163_p3 = scmp.lt.s32.totalorder (!%p139_p2), %s1364_s16, 127 }
   0xb   : > { %v1874_v0 = vld [vmem:[%s2131_s1 + $0x38] sm:$0xff]   ;;  %v1875_v1 = vld [vmem:[%s2131_s1 + $0x30] sm:$0xff]   ;;  %s2135_s16 = smov (!%p163_p3, %s1364_s16), 127  ;;  %v1876_v2 = vld [vmem:[%s2131_s1 + $0x28] sm:$0xff]  }
   0xc   : > { %1770 = vmatprep.subr.bf16.mxu0 %v1874_v0  ;;  %1850 = vmatprep.subr.bf16.mxu1 %v1874_v0  ;;  %s1365_s21 = sshll.u32 %s2135_s16, 2  ;;  %v1877_v3 = vld [vmem:[%s2131_s1 + $0x20] sm:$0xff]   ;;  %v1878_v6 = vld [vmem:[%s2131_s1 + $0x18] sm:$0xff]   ;;  %v1879_v7 = vld [vmem:[%s2131_s1 + $0x10] sm:$0xff]  }
   0xd   : > { %1771 = vmatpush3.bf16.msra.mxu0 %v1874_v0  ;;  %1858 = vmatpush3.bf16.msra.mxu1 %v1874_v0  ;;  %s1967_s24 = scalar_lea.vmem %s2130_s0, %s1365_s21  ;;  %v1880_v8 = vld [vmem:[%s2131_s1 + $0x8] sm:$0xff]   ;;  %v1881_v9 = vld [vmem:[%s2131_s1] sm:$0xff]   ;;  %s2034_s13 = scalar_lea.vmem %s2133_s3, %s1365_s21 }
   0xe   : > { %1772 = vmatprep.subr.bf16.mxu0 %v1875_v1  ;;  %1851 = vmatprep.subr.bf16.mxu1 %v1875_v1  ;;  %v1882_v4 = vld [vmem:[%s1967_s24] sm:$0xff]   ;;  %v1884_v10 = vld [vmem:[%s1967_s24 + $0x8] sm:$0xff]   ;;  %v1886_v12 = vld [vmem:[%s1967_s24 + $0x10] sm:$0xff]  }
   0xf   : > { %v1883_v5 = vld [vmem:[%s1967_s24 + $0x80] sm:$0xff]   ;;  %1786 = vmatprep.mubr.bf16.mxu0 %v1882_v4  ;;  %v1885_v11 = vld [vmem:[%s1967_s24 + $0x88] sm:$0xff]   ;;  %v1887_v13 = vld [vmem:[%s1967_s24 + $0x90] sm:$0xff]  }
  0x10   : > { %1818 = vmatprep.mubr.bf16.mxu1 %v1883_v5  ;;  %v1888_v14 = vld [vmem:[%s1967_s24 + $0x18] sm:$0xff]   ;;  %v1890_v16 = vld [vmem:[%s1967_s24 + $0x20] sm:$0xff]   ;;  %v1892_v18 = vld [vmem:[%s1967_s24 + $0x28] sm:$0xff]  }
  0x11   : > { %1773 = vmatpush3.bf16.msra.mxu0 %v1875_v1  ;;  %1859 = vmatpush3.bf16.msra.mxu1 %v1875_v1  ;;  %v1889_v15 = vld [vmem:[%s1967_s24 + $0x98] sm:$0xff]   ;;  %v1891_v17 = vld [vmem:[%s1967_s24 + $0xa0] sm:$0xff]   ;;  %v1893_v19 = vld [vmem:[%s1967_s24 + $0xa8] sm:$0xff]  }
  0x12   : > { %1774 = vmatprep.subr.bf16.mxu0 %v1876_v2  ;;  %1852 = vmatprep.subr.bf16.mxu1 %v1876_v2  ;;  %v1894_v20 = vld [vmem:[%s1967_s24 + $0x30] sm:$0xff]   ;;  %v1896_v22 = vld [vmem:[%s1967_s24 + $0x38] sm:$0xff]   ;;  %v1898_v24 = vld [vmem:[%s1967_s24 + $0x40] sm:$0xff]  }
  0x13   : > { %v1895_v21 = vld [vmem:[%s1967_s24 + $0xb0] sm:$0xff]   ;;  %v1897_v23 = vld [vmem:[%s1967_s24 + $0xb8] sm:$0xff]   ;;  %v1899_v25 = vld [vmem:[%s1967_s24 + $0xc0] sm:$0xff]  }
  0x14   : > { %v1900_v26 = vld [vmem:[%s1967_s24 + $0x48] sm:$0xff]   ;;  %v1902_v28 = vld [vmem:[%s1967_s24 + $0x50] sm:$0xff]   ;;  %v1904_v30 = vld [vmem:[%s1967_s24 + $0x58] sm:$0xff]  }
  0x15   : > { %1775 = vmatpush3.bf16.msra.mxu0 %v1876_v2  ;;  %1860 = vmatpush3.bf16.msra.mxu1 %v1876_v2  ;;  %v1901_v27 = vld [vmem:[%s1967_s24 + $0xc8] sm:$0xff]   ;;  %v1903_v29 = vld [vmem:[%s1967_s24 + $0xd0] sm:$0xff]   ;;  %v1905_v31 = vld [vmem:[%s1967_s24 + $0xd8] sm:$0xff]  }
  0x16   : > { %1776 = vmatprep.subr.bf16.mxu0 %v1877_v3  ;;  %1853 = vmatprep.subr.bf16.mxu1 %v1877_v3  ;;  %v1906_v32 = vld [vmem:[%s1967_s24 + $0x60] sm:$0xff]   ;;  %v1908_v34 = vld [vmem:[%s1967_s24 + $0x68] sm:$0xff]   ;;  %v1910_v36 = vld [vmem:[%s1967_s24 + $0x70] sm:$0xff]  }
  0x17   : > { %v1907_v33 = vld [vmem:[%s1967_s24 + $0xe0] sm:$0xff]   ;;  %v1909_v35 = vld [vmem:[%s1967_s24 + $0xe8] sm:$0xff]   ;;  %v1911_v37 = vld [vmem:[%s1967_s24 + $0xf0] sm:$0xff]  }
  0x18   : > { %v1912_v38 = vld [vmem:[%s1967_s24 + $0x78] sm:$0xff]   ;;  %v2019_v40 = vld [vmem:[%s2132_s2] ss:$0 sm:$0xff] }
  0x19   : > { %1777 = vmatpush3.bf16.msra.mxu0 %v1877_v3  ;;  %1861 = vmatpush3.bf16.msra.mxu1 %v1877_v3  ;;  %v1913_v39 = vld [vmem:[%s1967_s24 + $0xf8] sm:$0xff]  }
  0x1a   : > { %1778 = vmatprep.subr.bf16.mxu0 %v1878_v6  ;;  %1854 = vmatprep.subr.bf16.mxu1 %v1878_v6 }
  0x1d   : > { %1779 = vmatpush3.bf16.msra.mxu0 %v1878_v6  ;;  %1862 = vmatpush3.bf16.msra.mxu1 %v1878_v6 }
  0x1e   : > { %1780 = vmatprep.subr.bf16.mxu0 %v1879_v7  ;;  %1855 = vmatprep.subr.bf16.mxu1 %v1879_v7 }
  0x21   : > { %1781 = vmatpush3.bf16.msra.mxu0 %v1879_v7  ;;  %1863 = vmatpush3.bf16.msra.mxu1 %v1879_v7 }
  0x22   : > { %1782 = vmatprep.subr.bf16.mxu0 %v1880_v8  ;;  %1856 = vmatprep.subr.bf16.mxu1 %v1880_v8 }
  0x25   : > { %1783 = vmatpush3.bf16.msra.mxu0 %v1880_v8  ;;  %1864 = vmatpush3.bf16.msra.mxu1 %v1880_v8 }
  0x26   : > { %1784 = vmatprep.subr.bf16.mxu0 %v1881_v9  ;;  %1857 = vmatprep.subr.bf16.mxu1 %v1881_v9 }
  0x29   : > { %1785 = vmatpush3.bf16.msra.mxu0 %v1881_v9  ;;  %1865 = vmatpush3.bf16.msra.mxu1 %v1881_v9 }
  0x2c   : > { %1787 = vmatmul.mubr.bf16.vlgmr.msra.gmra.mxu0 %v1884_v10  ;;  %1819 = vmatmul.mubr.bf16.vlgmr.msra.gmra.mxu1 %v1885_v11 }
  0x2d   : > { %1790 = vmatprep.mubr.bf16.mxu0 %v1886_v12  ;;  %1822 = vmatprep.mubr.bf16.mxu1 %v1887_v13 }
  0x34   : > { %1791 = vmatmul.mubr.bf16.gmra.mxu0 %v1888_v14  ;;  %1823 = vmatmul.mubr.bf16.gmra.mxu1 %v1889_v15 }
  0x35   : > { %1794 = vmatprep.mubr.bf16.mxu0 %v1890_v16  ;;  %1826 = vmatprep.mubr.bf16.mxu1 %v1891_v17 }
  0x3c   : > { %1795 = vmatmul.mubr.bf16.gmra.mxu0 %v1892_v18  ;;  %1827 = vmatmul.mubr.bf16.gmra.mxu1 %v1893_v19 }
  0x3d   : > { %1798 = vmatprep.mubr.bf16.mxu0 %v1894_v20  ;;  %1830 = vmatprep.mubr.bf16.mxu1 %v1895_v21 }
  0x44   : > { %1799 = vmatmul.mubr.bf16.gmra.mxu0 %v1896_v22  ;;  %1831 = vmatmul.mubr.bf16.gmra.mxu1 %v1897_v23 }
  0x45   : > { %1802 = vmatprep.mubr.bf16.mxu0 %v1898_v24  ;;  %1834 = vmatprep.mubr.bf16.mxu1 %v1899_v25 }
  0x4c   : > { %1803 = vmatmul.mubr.bf16.gmra.mxu0 %v1900_v26  ;;  %1835 = vmatmul.mubr.bf16.gmra.mxu1 %v1901_v27 }
  0x4d   : > { %1806 = vmatprep.mubr.bf16.mxu0 %v1902_v28  ;;  %1838 = vmatprep.mubr.bf16.mxu1 %v1903_v29 }
  0x54   : > { %1807 = vmatmul.mubr.bf16.gmra.mxu0 %v1904_v30  ;;  %1839 = vmatmul.mubr.bf16.gmra.mxu1 %v1905_v31 }
  0x55   : > { %1810 = vmatprep.mubr.bf16.mxu0 %v1906_v32  ;;  %1842 = vmatprep.mubr.bf16.mxu1 %v1907_v33 }
  0x5c   : > { %1811 = vmatmul.mubr.bf16.gmra.mxu0 %v1908_v34  ;;  %1843 = vmatmul.mubr.bf16.gmra.mxu1 %v1909_v35 }
  0x5d   : > { %1814 = vmatprep.mubr.bf16.mxu0 %v1910_v36  ;;  %1846 = vmatprep.mubr.bf16.mxu1 %v1911_v37 }
  0x64   : > { %1815 = vmatmul.mubr.bf16.gmra.mxu0 %v1912_v38  ;;  %1847 = vmatmul.mubr.bf16.gmra.mxu1 %v1913_v39 }
  0xec   : > { %v1788_v41 = vpop.f32.mrf.mxu0  ;;  %v1820_v42 = vpop.f32.mrf.mxu1 }
  0xed   : > { %v545_v43 = vadd.f32 %v1788_v41, %v2019_v40  ;;  %v673_v44 = vadd.f32 %v1820_v42, %v2019_v40 }
  0xee   : > { %v536_v45 = vpop.f32.mrf.mxu0  ;;  %v664_v46 = vpop.f32.mrf.mxu1 }
  0xef   : > { %vm793_vm0 = vcmp.ge.f32.partialorder %v545_v43, 0.0  ;;  %v857_v47 = vmul.f32 0.2, %v545_v43  ;;  %vm825_vm1 = vcmp.ge.f32.partialorder %v673_v44, 0.0  ;;  %v889_v48 = vmul.f32 0.2, %v673_v44 }
  0xf0   : > { %v537_v49 = vadd.f32 %v2019_v40, %v536_v45  ;;  %v665_v50 = vadd.f32 %v2019_v40, %v664_v46  ;;  %v1789_v51 = vpop.f32.mrf.mxu0  ;;  %v1821_v52 = vpop.f32.mrf.mxu1 }
  0xf1   : > { %v921_v53 = vsel %vm793_vm0, %v545_v43, %v857_v47  ;;  %v548_v54 = vadd.f32 %v1789_v51, %v2019_v40  ;;  %v676_v55 = vadd.f32 %v1821_v52, %v2019_v40  ;;  %v953_v56 = vsel %vm825_vm1, %v673_v44, %v889_v48 }
  0xf2   : > { %vm791_vm2 = vcmp.ge.f32.partialorder %v537_v49, 0.0  ;;  %v855_v57 = vmul.f32 0.2, %v537_v49  ;;  %vm823_vm3 = vcmp.ge.f32.partialorder %v665_v50, 0.0  ;;  %v539_v58 = vpop.f32.mrf.mxu0  ;;  %v667_v59 = vpop.f32.mrf.mxu1  ;;  %v887_v63 = vmul.f32 0.2, %v665_v50 }
  0xf3   : > { %vm794_vm4 = vcmp.ge.f32.partialorder %v548_v54, 0.0  ;;  %v858_v60 = vmul.f32 0.2, %v548_v54  ;;  %vm826_vm5 = vcmp.ge.f32.partialorder %v676_v55, 0.0  ;;  %v890_v61 = vmul.f32 0.2, %v676_v55 }
  0xf4   : > { %v919_v62 = vsel %vm791_vm2, %v537_v49, %v855_v57  ;;  %v540_v0 = vadd.f32 %v2019_v40, %v539_v58  ;;  %v668_v1 = vadd.f32 %v2019_v40, %v667_v59  ;;  %v1792_v2 = vpop.f32.mrf.mxu0  ;;  %v1824_v3 = vpop.f32.mrf.mxu1  ;;  %v951_v15 = vsel %vm823_vm3, %v665_v50, %v887_v63 }
  0xf5   : > { %v922_v4 = vsel %vm794_vm4, %v548_v54, %v858_v60  ;;  %v954_v5 = vsel %vm826_vm5, %v676_v55, %v890_v61  ;;  %v561_v6 = vadd.f32 %v1792_v2, %v2019_v40  ;;  %v689_v7 = vadd.f32 %v1824_v3, %v2019_v40 }
  0xf6   : > { %v1547_v8 = vpack.c.bf16 %v922_v4, %v921_v53  ;;  %v1627_v9 = vpack.c.bf16 %v954_v5, %v953_v56  ;;  %vm792_vm6 = vcmp.ge.f32.partialorder %v540_v0, 0.0  ;;  %v856_v10 = vmul.f32 0.2, %v540_v0  ;;  %v552_v11 = vpop.f32.mrf.mxu0  ;;  %v680_v12 = vpop.f32.mrf.mxu1 }
  0xf7   : > { %vm824_vm7 = vcmp.ge.f32.partialorder %v668_v1, 0.0  ;;  %v888_v13 = vmul.f32 0.2, %v668_v1  ;;  %vm797_vm8 = vcmp.ge.f32.partialorder %v561_v6, 0.0  ;;  %v861_v14 = vmul.f32 0.2, %v561_v6 }
  0xf8   : > { %1699 = vst [vmem:[%s2034_s13 + $0x8] sm:$0xff] %v1547_v8   ;;  %1715 = vst [vmem:[%s2034_s13 + $0x88] sm:$0xff] %v1627_v9   ;;  %v920_v16 = vsel %vm792_vm6, %v540_v0, %v856_v10  ;;  %v893_v17 = vmul.f32 0.2, %v689_v7  ;;  %v553_v18 = vadd.f32 %v2019_v40, %v552_v11  ;;  %v1793_v19 = vpop.f32.mrf.mxu0  ;;  %v1825_v20 = vpop.f32.mrf.mxu1  ;;  %vm829_vm9 = vcmp.ge.f32.partialorder %v689_v7, 0.0 }
  0xf9   : > { %v1542_v21 = vpack.c.bf16 %v920_v16, %v919_v62  ;;  %v952_v22 = vsel %vm824_vm7, %v668_v1, %v888_v13  ;;  %v681_v23 = vadd.f32 %v2019_v40, %v680_v12  ;;  %v925_v25 = vsel %vm797_vm8, %v561_v6, %v861_v14 }
  0xfa   : > { %v1622_v24 = vpack.c.bf16 %v952_v22, %v951_v15  ;;  %vm795_vm10 = vcmp.ge.f32.partialorder %v553_v18, 0.0  ;;  %v859_v26 = vmul.f32 0.2, %v553_v18  ;;  %v555_v27 = vpop.f32.mrf.mxu0  ;;  %v683_v28 = vpop.f32.mrf.mxu1  ;;  %v564_v30 = vadd.f32 %v1793_v19, %v2019_v40 }
  0xfb   : > { %1543 = vst [vmem:[%s2034_s13] sm:$0xff] %v1542_v21   ;;  %vm827_vm11 = vcmp.ge.f32.partialorder %v681_v23, 0.0  ;;  %v891_v29 = vmul.f32 0.2, %v681_v23  ;;  %v692_v31 = vadd.f32 %v1825_v20, %v2019_v40  ;;  %v957_v32 = vsel %vm829_vm9, %v689_v7, %v893_v17 }
  0xfc   : > { %1714 = vst [vmem:[%s2034_s13 + $0x80] sm:$0xff] %v1622_v24   ;;  %v923_v33 = vsel %vm795_vm10, %v553_v18, %v859_v26  ;;  %v556_v34 = vadd.f32 %v2019_v40, %v555_v27  ;;  %v684_v35 = vadd.f32 %v2019_v40, %v683_v28  ;;  %v1796_v36 = vpop.f32.mrf.mxu0  ;;  %v1828_v37 = vpop.f32.mrf.mxu1  ;;  %vm798_vm12 = vcmp.ge.f32.partialorder %v564_v30, 0.0 }
  0xfd   : > { %v955_v38 = vsel %vm827_vm11, %v681_v23, %v891_v29  ;;  %v862_v39 = vmul.f32 0.2, %v564_v30  ;;  %vm830_vm13 = vcmp.ge.f32.partialorder %v692_v31, 0.0  ;;  %v894_v41 = vmul.f32 0.2, %v692_v31 }
  0xfe   : > { %vm796_vm14 = vcmp.ge.f32.partialorder %v556_v34, 0.0  ;;  %v860_v42 = vmul.f32 0.2, %v556_v34  ;;  %vm828_vm15 = vcmp.ge.f32.partialorder %v684_v35, 0.0  ;;  %v568_v43 = vpop.f32.mrf.mxu0  ;;  %v696_v44 = vpop.f32.mrf.mxu1  ;;  %v892_v46 = vmul.f32 0.2, %v684_v35 }
  0xff   : > { %v926_v45 = vsel %vm798_vm12, %v564_v30, %v862_v39  ;;  %v577_v47 = vadd.f32 %v1796_v36, %v2019_v40  ;;  %v705_v48 = vadd.f32 %v1828_v37, %v2019_v40  ;;  %v958_v50 = vsel %vm830_vm13, %v692_v31, %v894_v41 }
 0x100   : > { %v1557_v49 = vpack.c.bf16 %v926_v45, %v925_v25  ;;  %v924_v51 = vsel %vm796_vm14, %v556_v34, %v860_v42  ;;  %v569_v52 = vadd.f32 %v2019_v40, %v568_v43  ;;  %v1797_v53 = vpop.f32.mrf.mxu0  ;;  %v1829_v54 = vpop.f32.mrf.mxu1  ;;  %v1637_v55 = vpack.c.bf16 %v958_v50, %v957_v32 }
 0x101   : > { %v1552_v56 = vpack.c.bf16 %v924_v51, %v923_v33  ;;  %v956_v57 = vsel %vm828_vm15, %v684_v35, %v892_v46  ;;  %vm801_vm0 = vcmp.ge.f32.partialorder %v577_v47, 0.0  ;;  %v865_v59 = vmul.f32 0.2, %v577_v47 }
 0x102   : > { %1701 = vst [vmem:[%s2034_s13 + $0x18] sm:$0xff] %v1557_v49   ;;  %v1632_v58 = vpack.c.bf16 %v956_v57, %v955_v38  ;;  %vm833_vm1 = vcmp.ge.f32.partialorder %v705_v48, 0.0  ;;  %v897_v60 = vmul.f32 0.2, %v705_v48  ;;  %v571_v61 = vpop.f32.mrf.mxu0  ;;  %v699_v62 = vpop.f32.mrf.mxu1  ;;  %1717 = vst [vmem:[%s2034_s13 + $0x98] sm:$0xff] %v1637_v55   ;;  %vm799_vm2 = vcmp.ge.f32.partialorder %v569_v52, 0.0 }
 0x103   : > { %1700 = vst [vmem:[%s2034_s13 + $0x10] sm:$0xff] %v1552_v56   ;;  %v863_v63 = vmul.f32 0.2, %v569_v52  ;;  %v697_v0 = vadd.f32 %v2019_v40, %v696_v44  ;;  %v580_v1 = vadd.f32 %v1797_v53, %v2019_v40  ;;  %v929_v2 = vsel %vm801_vm0, %v577_v47, %v865_v59 }
 0x104   : > { %1716 = vst [vmem:[%s2034_s13 + $0x90] sm:$0xff] %v1632_v58   ;;  %v961_v3 = vsel %vm833_vm1, %v705_v48, %v897_v60  ;;  %v708_v4 = vadd.f32 %v1829_v54, %v2019_v40  ;;  %v572_v5 = vadd.f32 %v2019_v40, %v571_v61  ;;  %v1800_v6 = vpop.f32.mrf.mxu0  ;;  %v1832_v7 = vpop.f32.mrf.mxu1  ;;  %v700_v16 = vadd.f32 %v2019_v40, %v699_v62 }
 0x105   : > { %v927_v8 = vsel %vm799_vm2, %v569_v52, %v863_v63  ;;  %vm831_vm3 = vcmp.ge.f32.partialorder %v697_v0, 0.0  ;;  %v895_v9 = vmul.f32 0.2, %v697_v0  ;;  %vm802_vm4 = vcmp.ge.f32.partialorder %v580_v1, 0.0 }
 0x106   : > { %v866_v10 = vmul.f32 0.2, %v580_v1  ;;  %vm834_vm5 = vcmp.ge.f32.partialorder %v708_v4, 0.0  ;;  %v898_v11 = vmul.f32 0.2, %v708_v4  ;;  %vm800_vm6 = vcmp.ge.f32.partialorder %v572_v5, 0.0  ;;  %v584_v12 = vpop.f32.mrf.mxu0  ;;  %v712_v13 = vpop.f32.mrf.mxu1 }
 0x107   : > { %v959_v14 = vsel %vm831_vm3, %v697_v0, %v895_v9  ;;  %v864_v15 = vmul.f32 0.2, %v572_v5  ;;  %v593_v17 = vadd.f32 %v1800_v6, %v2019_v40  ;;  %v721_v20 = vadd.f32 %v1832_v7, %v2019_v40 }
 0x108   : > { %v930_v18 = vsel %vm802_vm4, %v580_v1, %v866_v10  ;;  %v962_v19 = vsel %vm834_vm5, %v708_v4, %v898_v11  ;;  %v585_v21 = vadd.f32 %v2019_v40, %v584_v12  ;;  %v1801_v22 = vpop.f32.mrf.mxu0  ;;  %v1833_v23 = vpop.f32.mrf.mxu1  ;;  %vm832_vm7 = vcmp.ge.f32.partialorder %v700_v16, 0.0 }
 0x109   : > { %v1567_v24 = vpack.c.bf16 %v930_v18, %v929_v2  ;;  %v1647_v25 = vpack.c.bf16 %v962_v19, %v961_v3  ;;  %v928_v26 = vsel %vm800_vm6, %v572_v5, %v864_v15  ;;  %v896_v28 = vmul.f32 0.2, %v700_v16 }
 0x10a   : > { %v1562_v27 = vpack.c.bf16 %v928_v26, %v927_v8  ;;  %vm805_vm8 = vcmp.ge.f32.partialorder %v593_v17, 0.0  ;;  %v869_v29 = vmul.f32 0.2, %v593_v17  ;;  %v587_v30 = vpop.f32.mrf.mxu0  ;;  %v715_v31 = vpop.f32.mrf.mxu1  ;;  %vm837_vm9 = vcmp.ge.f32.partialorder %v721_v20, 0.0 }
 0x10b   : > { %1703 = vst [vmem:[%s2034_s13 + $0x28] sm:$0xff] %v1567_v24   ;;  %1719 = vst [vmem:[%s2034_s13 + $0xa8] sm:$0xff] %v1647_v25   ;;  %v901_v32 = vmul.f32 0.2, %v721_v20  ;;  %vm803_vm10 = vcmp.ge.f32.partialorder %v585_v21, 0.0  ;;  %v960_v34 = vsel %vm832_vm7, %v700_v16, %v896_v28  ;;  %v713_v36 = vadd.f32 %v2019_v40, %v712_v13 }
 0x10c   : > { %v867_v33 = vmul.f32 0.2, %v585_v21  ;;  %1702 = vst [vmem:[%s2034_s13 + $0x20] sm:$0xff] %v1562_v27   ;;  %v933_v35 = vsel %vm805_vm8, %v593_v17, %v869_v29  ;;  %v596_v37 = vadd.f32 %v1801_v22, %v2019_v40  ;;  %v1804_v38 = vpop.f32.mrf.mxu0  ;;  %v1836_v39 = vpop.f32.mrf.mxu1  ;;  %v1642_v41 = vpack.c.bf16 %v960_v34, %v959_v14 }
 0x10d   : > { %v965_v42 = vsel %vm837_vm9, %v721_v20, %v901_v32  ;;  %v724_v44 = vadd.f32 %v1833_v23, %v2019_v40  ;;  %vm835_vm11 = vcmp.ge.f32.partialorder %v713_v36, 0.0  ;;  %v899_v45 = vmul.f32 0.2, %v713_v36 }
 0x10e   : > { %v931_v43 = vsel %vm803_vm10, %v585_v21, %v867_v33  ;;  %vm806_vm12 = vcmp.ge.f32.partialorder %v596_v37, 0.0  ;;  %v870_v46 = vmul.f32 0.2, %v596_v37  ;;  %v600_v47 = vpop.f32.mrf.mxu0  ;;  %v728_v48 = vpop.f32.mrf.mxu1  ;;  %1718 = vst [vmem:[%s2034_s13 + $0xa0] sm:$0xff] %v1642_v41   ;;  %v588_v50 = vadd.f32 %v2019_v40, %v587_v30 }
 0x10f   : > { %vm838_vm13 = vcmp.ge.f32.partialorder %v724_v44, 0.0  ;;  %v902_v49 = vmul.f32 0.2, %v724_v44  ;;  %v716_v51 = vadd.f32 %v2019_v40, %v715_v31  ;;  %v963_v52 = vsel %vm835_vm11, %v713_v36, %v899_v45 }
 0x110   : > { %v934_v53 = vsel %vm806_vm12, %v596_v37, %v870_v46  ;;  %v609_v54 = vadd.f32 %v1804_v38, %v2019_v40  ;;  %v737_v55 = vadd.f32 %v1836_v39, %v2019_v40  ;;  %v1805_v56 = vpop.f32.mrf.mxu0  ;;  %v1837_v57 = vpop.f32.mrf.mxu1  ;;  %vm804_vm14 = vcmp.ge.f32.partialorder %v588_v50, 0.0 }
 0x111   : > { %v1577_v58 = vpack.c.bf16 %v934_v53, %v933_v35  ;;  %v966_v59 = vsel %vm838_vm13, %v724_v44, %v902_v49  ;;  %v868_v60 = vmul.f32 0.2, %v588_v50  ;;  %vm836_vm15 = vcmp.ge.f32.partialorder %v716_v51, 0.0 }
 0x112   : > { %v1657_v61 = vpack.c.bf16 %v966_v59, %v965_v42  ;;  %v900_v62 = vmul.f32 0.2, %v716_v51  ;;  %vm809_vm0 = vcmp.ge.f32.partialorder %v609_v54, 0.0  ;;  %v603_v63 = vpop.f32.mrf.mxu0  ;;  %v731_v0 = vpop.f32.mrf.mxu1  ;;  %v873_v2 = vmul.f32 0.2, %v609_v54 }
 0x113   : > { %1705 = vst [vmem:[%s2034_s13 + $0x38] sm:$0xff] %v1577_v58   ;;  %v932_v1 = vsel %vm804_vm14, %v588_v50, %v868_v60  ;;  %vm841_vm1 = vcmp.ge.f32.partialorder %v737_v55, 0.0  ;;  %v905_v3 = vmul.f32 0.2, %v737_v55  ;;  %v601_v6 = vadd.f32 %v2019_v40, %v600_v47 }
 0x114   : > { %1721 = vst [vmem:[%s2034_s13 + $0xb8] sm:$0xff] %v1657_v61   ;;  %v1572_v4 = vpack.c.bf16 %v932_v1, %v931_v43  ;;  %v964_v5 = vsel %vm836_vm15, %v716_v51, %v900_v62  ;;  %v729_v7 = vadd.f32 %v2019_v40, %v728_v48  ;;  %v1808_v8 = vpop.f32.mrf.mxu0  ;;  %v1840_v9 = vpop.f32.mrf.mxu1  ;;  %v937_v11 = vsel %vm809_vm0, %v609_v54, %v873_v2 }
 0x115   : > { %v1652_v10 = vpack.c.bf16 %v964_v5, %v963_v52  ;;  %v969_v12 = vsel %vm841_vm1, %v737_v55, %v905_v3  ;;  %v612_v13 = vadd.f32 %v1805_v56, %v2019_v40  ;;  %vm807_vm2 = vcmp.ge.f32.partialorder %v601_v6, 0.0 }
 0x116   : > { %1704 = vst [vmem:[%s2034_s13 + $0x30] sm:$0xff] %v1572_v4   ;;  %v871_v14 = vmul.f32 0.2, %v601_v6  ;;  %vm839_vm3 = vcmp.ge.f32.partialorder %v729_v7, 0.0  ;;  %v903_v15 = vmul.f32 0.2, %v729_v7  ;;  %v616_v16 = vpop.f32.mrf.mxu0  ;;  %v744_v17 = vpop.f32.mrf.mxu1  ;;  %v740_v19 = vadd.f32 %v1837_v57, %v2019_v40 }
 0x117   : > { %1720 = vst [vmem:[%s2034_s13 + $0xb0] sm:$0xff] %v1652_v10   ;;  %vm810_vm4 = vcmp.ge.f32.partialorder %v612_v13, 0.0  ;;  %v874_v18 = vmul.f32 0.2, %v612_v13  ;;  %v604_v20 = vadd.f32 %v2019_v40, %v603_v63  ;;  %v732_v23 = vadd.f32 %v2019_v40, %v731_v0 }
 0x118   : > { %v935_v21 = vsel %vm807_vm2, %v601_v6, %v871_v14  ;;  %v967_v22 = vsel %vm839_vm3, %v729_v7, %v903_v15  ;;  %v625_v24 = vadd.f32 %v1808_v8, %v2019_v40  ;;  %v1809_v25 = vpop.f32.mrf.mxu0  ;;  %v1841_v26 = vpop.f32.mrf.mxu1  ;;  %vm842_vm5 = vcmp.ge.f32.partialorder %v740_v19, 0.0 }
 0x119   : > { %v938_v27 = vsel %vm810_vm4, %v612_v13, %v874_v18  ;;  %v906_v28 = vmul.f32 0.2, %v740_v19  ;;  %vm808_vm6 = vcmp.ge.f32.partialorder %v604_v20, 0.0  ;;  %v872_v30 = vmul.f32 0.2, %v604_v20 }
 0x11a   : > { %v1587_v29 = vpack.c.bf16 %v938_v27, %v937_v11  ;;  %vm840_vm7 = vcmp.ge.f32.partialorder %v732_v23, 0.0  ;;  %v904_v31 = vmul.f32 0.2, %v732_v23  ;;  %v619_v32 = vpop.f32.mrf.mxu0  ;;  %v747_v33 = vpop.f32.mrf.mxu1  ;;  %vm813_vm8 = vcmp.ge.f32.partialorder %v625_v24, 0.0 }
 0x11b   : > { %v970_v34 = vsel %vm842_vm5, %v740_v19, %v906_v28  ;;  %v877_v35 = vmul.f32 0.2, %v625_v24  ;;  %v753_v36 = vadd.f32 %v1840_v9, %v2019_v40  ;;  %v936_v38 = vsel %vm808_vm6, %v604_v20, %v872_v30 }
 0x11c   : > { %1707 = vst [vmem:[%s2034_s13 + $0x48] sm:$0xff] %v1587_v29   ;;  %v1667_v37 = vpack.c.bf16 %v970_v34, %v969_v12  ;;  %v968_v39 = vsel %vm840_vm7, %v732_v23, %v904_v31  ;;  %v617_v41 = vadd.f32 %v2019_v40, %v616_v16  ;;  %v1812_v42 = vpop.f32.mrf.mxu0  ;;  %v1844_v43 = vpop.f32.mrf.mxu1  ;;  %v1582_v44 = vpack.c.bf16 %v936_v38, %v935_v21 }
 0x11d   : > { %v1662_v45 = vpack.c.bf16 %v968_v39, %v967_v22  ;;  %v941_v46 = vsel %vm813_vm8, %v625_v24, %v877_v35  ;;  %vm845_vm9 = vcmp.ge.f32.partialorder %v753_v36, 0.0  ;;  %v909_v47 = vmul.f32 0.2, %v753_v36 }
 0x11e   : > { %1723 = vst [vmem:[%s2034_s13 + $0xc8] sm:$0xff] %v1667_v37   ;;  %vm811_vm10 = vcmp.ge.f32.partialorder %v617_v41, 0.0  ;;  %v875_v48 = vmul.f32 0.2, %v617_v41  ;;  %v745_v49 = vadd.f32 %v2019_v40, %v744_v17  ;;  %v632_v50 = vpop.f32.mrf.mxu0  ;;  %v760_v51 = vpop.f32.mrf.mxu1  ;;  %1706 = vst [vmem:[%s2034_s13 + $0x40] sm:$0xff] %v1582_v44   ;;  %v628_v52 = vadd.f32 %v1809_v25, %v2019_v40 }
 0x11f   : > { %1722 = vst [vmem:[%s2034_s13 + $0xc0] sm:$0xff] %v1662_v45   ;;  %v756_v53 = vadd.f32 %v1841_v26, %v2019_v40  ;;  %v620_v54 = vadd.f32 %v2019_v40, %v619_v32  ;;  %v748_v55 = vadd.f32 %v2019_v40, %v747_v33  ;;  %v973_v56 = vsel %vm845_vm9, %v753_v36, %v909_v47 }
 0x120   : > { %v939_v57 = vsel %vm811_vm10, %v617_v41, %v875_v48  ;;  %vm843_vm11 = vcmp.ge.f32.partialorder %v745_v49, 0.0  ;;  %v907_v58 = vmul.f32 0.2, %v745_v49  ;;  %v1813_v59 = vpop.f32.mrf.mxu0  ;;  %v1845_v60 = vpop.f32.mrf.mxu1  ;;  %vm814_vm12 = vcmp.ge.f32.partialorder %v628_v52, 0.0 }
 0x121   : > { %v878_v61 = vmul.f32 0.2, %v628_v52  ;;  %vm846_vm13 = vcmp.ge.f32.partialorder %v756_v53, 0.0  ;;  %v910_v62 = vmul.f32 0.2, %v756_v53  ;;  %vm812_vm14 = vcmp.ge.f32.partialorder %v620_v54, 0.0 }
 0x122   : > { %v971_v63 = vsel %vm843_vm11, %v745_v49, %v907_v58  ;;  %v876_v0 = vmul.f32 0.2, %v620_v54  ;;  %vm844_vm15 = vcmp.ge.f32.partialorder %v748_v55, 0.0  ;;  %v635_v1 = vpop.f32.mrf.mxu0  ;;  %v763_v2 = vpop.f32.mrf.mxu1  ;;  %v908_v5 = vmul.f32 0.2, %v748_v55 }
 0x123   : > { %v942_v3 = vsel %vm814_vm12, %v628_v52, %v878_v61  ;;  %v974_v4 = vsel %vm846_vm13, %v756_v53, %v910_v62  ;;  %v641_v6 = vadd.f32 %v1812_v42, %v2019_v40  ;;  %v769_v10 = vadd.f32 %v1844_v43, %v2019_v40 }
 0x124   : > { %v1597_v7 = vpack.c.bf16 %v942_v3, %v941_v46  ;;  %v1677_v8 = vpack.c.bf16 %v974_v4, %v973_v56  ;;  %v940_v9 = vsel %vm812_vm14, %v620_v54, %v876_v0  ;;  %v1816_v11 = vpop.f32.mrf.mxu0  ;;  %v1848_v12 = vpop.f32.mrf.mxu1  ;;  %v972_v14 = vsel %vm844_vm15, %v748_v55, %v908_v5 }
 0x125   : > { %v1592_v13 = vpack.c.bf16 %v940_v9, %v939_v57  ;;  %vm817_vm0 = vcmp.ge.f32.partialorder %v641_v6, 0.0  ;;  %v881_v15 = vmul.f32 0.2, %v641_v6  ;;  %v1672_v16 = vpack.c.bf16 %v972_v14, %v971_v63 }
 0x126   : > { %1709 = vst [vmem:[%s2034_s13 + $0x58] sm:$0xff] %v1597_v7   ;;  %1725 = vst [vmem:[%s2034_s13 + $0xd8] sm:$0xff] %v1677_v8   ;;  %vm849_vm1 = vcmp.ge.f32.partialorder %v769_v10, 0.0  ;;  %v913_v17 = vmul.f32 0.2, %v769_v10  ;;  %v633_v18 = vadd.f32 %v2019_v40, %v632_v50  ;;  %v761_v19 = vadd.f32 %v2019_v40, %v760_v51  ;;  %v648_v25 = vpop.f32.mrf.mxu0  ;;  %v776_v26 = vpop.f32.mrf.mxu1 }
 0x127   : > { %1708 = vst [vmem:[%s2034_s13 + $0x50] sm:$0xff] %v1592_v13   ;;  %v644_v20 = vadd.f32 %v1813_v59, %v2019_v40  ;;  %v772_v21 = vadd.f32 %v1845_v60, %v2019_v40  ;;  %1724 = vst [vmem:[%s2034_s13 + $0xd0] sm:$0xff] %v1672_v16   ;;  %v945_v22 = vsel %vm817_vm0, %v641_v6, %v881_v15 }
 0x128   : > { %vm815_vm2 = vcmp.ge.f32.partialorder %v633_v18, 0.0  ;;  %v879_v23 = vmul.f32 0.2, %v633_v18  ;;  %v636_v24 = vadd.f32 %v2019_v40, %v635_v1  ;;  %v977_v27 = vsel %vm849_vm1, %v769_v10, %v913_v17  ;;  %v1817_v39 = vpop.f32.mrf.mxu0  ;;  %v1849_v41 = vpop.f32.mrf.mxu1 }
 0x129   : > { %vm847_vm3 = vcmp.ge.f32.partialorder %v761_v19, 0.0  ;;  %vm818_vm4 = vcmp.ge.f32.partialorder %v644_v20, 0.0  ;;  %v882_v28 = vmul.f32 0.2, %v644_v20  ;;  %v911_v29 = vmul.f32 0.2, %v761_v19 }
 0x12a   : > { %vm850_vm5 = vcmp.ge.f32.partialorder %v772_v21, 0.0  ;;  %v914_v30 = vmul.f32 0.2, %v772_v21  ;;  %vm816_vm6 = vcmp.ge.f32.partialorder %v636_v24, 0.0  ;;  %v943_v31 = vsel %vm815_vm2, %v633_v18, %v879_v23  ;;  %v651_v55 = vpop.f32.mrf.mxu0  ;;  %v779_v56 = vpop.f32.mrf.mxu1 }
 0x12b   : > { %v946_v32 = vsel %vm818_vm4, %v644_v20, %v882_v28  ;;  %v880_v33 = vmul.f32 0.2, %v636_v24  ;;  %v764_v34 = vadd.f32 %v2019_v40, %v763_v2  ;;  %v657_v37 = vadd.f32 %v1816_v11, %v2019_v40 }
 0x12c   : > { %v1607_v35 = vpack.c.bf16 %v946_v32, %v945_v22  ;;  %v978_v36 = vsel %vm850_vm5, %v772_v21, %v914_v30  ;;  %v785_v38 = vadd.f32 %v1848_v12, %v2019_v40  ;;  %v975_v45 = vsel %vm847_vm3, %v761_v19, %v911_v29 }
 0x12d   : > { %v1687_v42 = vpack.c.bf16 %v978_v36, %v977_v27  ;;  %v944_v43 = vsel %vm816_vm6, %v636_v24, %v880_v33  ;;  %vm848_vm7 = vcmp.ge.f32.partialorder %v764_v34, 0.0  ;;  %v912_v44 = vmul.f32 0.2, %v764_v34 }
 0x12e   : > { %1711 = vst [vmem:[%s2034_s13 + $0x68] sm:$0xff] %v1607_v35   ;;  %v1602_v46 = vpack.c.bf16 %v944_v43, %v943_v31  ;;  %vm821_vm8 = vcmp.ge.f32.partialorder %v657_v37, 0.0  ;;  %v885_v47 = vmul.f32 0.2, %v657_v37  ;;  %vm853_vm9 = vcmp.ge.f32.partialorder %v785_v38, 0.0 }
 0x12f   : > { %1727 = vst [vmem:[%s2034_s13 + $0xe8] sm:$0xff] %v1687_v42   ;;  %v976_v48 = vsel %vm848_vm7, %v764_v34, %v912_v44  ;;  %v917_v49 = vmul.f32 0.2, %v785_v38  ;;  %v649_v50 = vadd.f32 %v2019_v40, %v648_v25  ;;  %v777_v52 = vadd.f32 %v2019_v40, %v776_v26 }
 0x130   : > { %1710 = vst [vmem:[%s2034_s13 + $0x60] sm:$0xff] %v1602_v46   ;;  %v1682_v51 = vpack.c.bf16 %v976_v48, %v975_v45  ;;  %v660_v53 = vadd.f32 %v1817_v39, %v2019_v40  ;;  %v788_v54 = vadd.f32 %v1849_v41, %v2019_v40  ;;  %v949_v57 = vsel %vm821_vm8, %v657_v37, %v885_v47 }
 0x131   : > { %v981_v58 = vsel %vm853_vm9, %v785_v38, %v917_v49  ;;  %v883_v60 = vmul.f32 0.2, %v649_v50  ;;  %v652_v62 = vadd.f32 %v2019_v40, %v651_v55  ;;  %v780_v63 = vadd.f32 %v2019_v40, %v779_v56 }
 0x132   : > { %1726 = vst [vmem:[%s2034_s13 + $0xe0] sm:$0xff] %v1682_v51   ;;  %vm822_vm10 = vcmp.ge.f32.partialorder %v660_v53, 0.0  ;;  %v886_v59 = vmul.f32 0.2, %v660_v53  ;;  %vm854_vm11 = vcmp.ge.f32.partialorder %v788_v54, 0.0  ;;  %vm819_vm12 = vcmp.ge.f32.partialorder %v649_v50, 0.0 }
 0x133   : > { %v918_v61 = vmul.f32 0.2, %v788_v54  ;;  %vm851_vm13 = vcmp.ge.f32.partialorder %v777_v52, 0.0  ;;  %v915_v0 = vmul.f32 0.2, %v777_v52  ;;  %vm820_vm14 = vcmp.ge.f32.partialorder %v652_v62, 0.0 }
 0x134   : > { %v950_v1 = vsel %vm822_vm10, %v660_v53, %v886_v59  ;;  %v884_v4 = vmul.f32 0.2, %v652_v62  ;;  %vm852_vm15 = vcmp.ge.f32.partialorder %v780_v63, 0.0  ;;  %v916_v6 = vmul.f32 0.2, %v780_v63 }
 0x135   : > { %v1617_v2 = vpack.c.bf16 %v950_v1, %v949_v57  ;;  %v982_v3 = vsel %vm854_vm11, %v788_v54, %v918_v61  ;;  %v947_v7 = vsel %vm819_vm12, %v649_v50, %v883_v60  ;;  %v979_v9 = vsel %vm851_vm13, %v777_v52, %v915_v0 }
 0x136   : > { %v1697_v5 = vpack.c.bf16 %v982_v3, %v981_v58  ;;  %v948_v8 = vsel %vm820_vm14, %v652_v62, %v884_v4  ;;  %v980_v10 = vsel %vm852_vm15, %v780_v63, %v916_v6 }
 0x137   : > { %1713 = vst [vmem:[%s2034_s13 + $0x78] sm:$0xff] %v1617_v2   ;;  %v1612_v40 = vpack.c.bf16 %v948_v8, %v947_v7  ;;  %v1692_v11 = vpack.c.bf16 %v980_v10, %v979_v9 }
 0x138   : > { %1729 = vst [vmem:[%s2034_s13 + $0xf8] sm:$0xff] %v1697_v5  }
 0x139   : > { %1712 = vst [vmem:[%s2034_s13 + $0x70] sm:$0xff] %v1612_v40   ;;  %1728 = vst [vmem:[%s2034_s13 + $0xf0] sm:$0xff] %v1692_v11  }
 0x13a PF: > { %s13_s12 = sadd.s32 1, %s1920_s12  }
 0x13b   : > { %p10_p4 = scmp.ge.s32.totalorder %s13_s12, 4  }
 0x13d   :  { %12 = sbr.rel (!%p10_p4) target bundleno = 1 (0x1), region = 62 }

// kernel: gan_cmp_d_forward.6
= control target key start
LH: loop header
LB: loop body
LE: loop exit
PB: predicated region body
PF: predicated region fallthrough
CT: control target
= control target key end

     0   :  { %s959_s1 = inlined_call_operand.vmem [shape: bf16[128,128], index: 1, kind: input, shape index: {}]   ;;  %s960_s0 = inlined_call_operand.vmem [shape: bf16[256,128], index: 0, kind: input, shape index: {}]   ;;  %s961_s2 = inlined_call_operand.vmem [shape: bf16[256,128], index: 2, kind: output, shape index: {}]  }
   0x1   :  { %v800_v0 = vld [vmem:[%s959_s1 + $0x38] sm:$0xff]   ;;  %v801_v1 = vld [vmem:[%s959_s1 + $0x30] sm:$0xff]   ;;  %v802_v2 = vld [vmem:[%s959_s1 + $0x28] sm:$0xff]  }
   0x2   :  { %736 = vmatprep.subr.bf16.mxu0 %v800_v0  ;;  %784 = vmatprep.subr.bf16.mxu1 %v800_v0  ;;  %v803_v3 = vld [vmem:[%s959_s1 + $0x20] sm:$0xff]   ;;  %v804_v6 = vld [vmem:[%s959_s1 + $0x18] sm:$0xff]   ;;  %v805_v7 = vld [vmem:[%s959_s1 + $0x10] sm:$0xff]  }
   0x3   :  { %737 = vmatpush3.bf16.msra.mxu0 %v800_v0  ;;  %792 = vmatpush3.bf16.msra.mxu1 %v800_v0  ;;  %v808_v4 = vld [vmem:[%s960_s0] sm:$0xff]   ;;  %v806_v8 = vld [vmem:[%s959_s1 + $0x8] sm:$0xff]   ;;  %v812_v12 = vld [vmem:[%s960_s0 + $0x10] sm:$0xff]  }
   0x4   :  { %738 = vmatprep.subr.bf16.mxu0 %v801_v1  ;;  %785 = vmatprep.subr.bf16.mxu1 %v801_v1  ;;  %v809_v5 = vld [vmem:[%s960_s0 + $0x40] sm:$0xff]   ;;  %v810_v10 = vld [vmem:[%s960_s0 + $0x8] sm:$0xff]   ;;  %v813_v13 = vld [vmem:[%s960_s0 + $0x50] sm:$0xff]  }
   0x5   :  { %752 = vmatprep.mubr.bf16.mxu0 %v808_v4  ;;  %768 = vmatprep.mubr.bf16.mxu1 %v809_v5  ;;  %v807_v9 = vld [vmem:[%s959_s1] sm:$0xff]   ;;  %v811_v11 = vld [vmem:[%s960_s0 + $0x48] sm:$0xff]   ;;  %v814_v14 = vld [vmem:[%s960_s0 + $0x18] sm:$0xff]  }
   0x6   :  { %v815_v15 = vld [vmem:[%s960_s0 + $0x58] sm:$0xff]   ;;  %v816_v16 = vld [vmem:[%s960_s0 + $0x20] sm:$0xff]   ;;  %v818_v18 = vld [vmem:[%s960_s0 + $0x28] sm:$0xff]  }
   0x7   :  { %739 = vmatpush3.bf16.msra.mxu0 %v801_v1  ;;  %793 = vmatpush3.bf16.msra.mxu1 %v801_v1  ;;  %v817_v17 = vld [vmem:[%s960_s0 + $0x60] sm:$0xff]   ;;  %v819_v19 = vld [vmem:[%s960_s0 + $0x68] sm:$0xff]   ;;  %v820_v20 = vld [vmem:[%s960_s0 + $0x30] sm:$0xff]  }
   0x8   :  { %740 = vmatprep.subr.bf16.mxu0 %v802_v2  ;;  %786 = vmatprep.subr.bf16.mxu1 %v802_v2  ;;  %v821_v21 = vld [vmem:[%s960_s0 + $0x70] sm:$0xff]   ;;  %v822_v22 = vld [vmem:[%s960_s0 + $0x38] sm:$0xff]  }
   0x9   :  { %v823_v23 = vld [vmem:[%s960_s0 + $0x78] sm:$0xff]  }
   0xb   :  { %741 = vmatpush3.bf16.msra.mxu0 %v802_v2  ;;  %794 = vmatpush3.bf16.msra.mxu1 %v802_v2 }
   0xc   :  { %742 = vmatprep.subr.bf16.mxu0 %v803_v3  ;;  %787 = vmatprep.subr.bf16.mxu1 %v803_v3 }
   0xf   :  { %743 = vmatpush3.bf16.msra.mxu0 %v803_v3  ;;  %795 = vmatpush3.bf16.msra.mxu1 %v803_v3 }
  0x10   :  { %744 = vmatprep.subr.bf16.mxu0 %v804_v6  ;;  %788 = vmatprep.subr.bf16.mxu1 %v804_v6 }
  0x13   :  { %745 = vmatpush3.bf16.msra.mxu0 %v804_v6  ;;  %796 = vmatpush3.bf16.msra.mxu1 %v804_v6 }
  0x14   :  { %746 = vmatprep.subr.bf16.mxu0 %v805_v7  ;;  %789 = vmatprep.subr.bf16.mxu1 %v805_v7 }
  0x17   :  { %747 = vmatpush3.bf16.msra.mxu0 %v805_v7  ;;  %797 = vmatpush3.bf16.msra.mxu1 %v805_v7 }
  0x18   :  { %748 = vmatprep.subr.bf16.mxu0 %v806_v8  ;;  %790 = vmatprep.subr.bf16.mxu1 %v806_v8 }
  0x1b   :  { %749 = vmatpush3.bf16.msra.mxu0 %v806_v8  ;;  %798 = vmatpush3.bf16.msra.mxu1 %v806_v8 }
  0x1c   :  { %750 = vmatprep.subr.bf16.mxu0 %v807_v9  ;;  %791 = vmatprep.subr.bf16.mxu1 %v807_v9 }
  0x1f   :  { %751 = vmatpush3.bf16.msra.mxu0 %v807_v9  ;;  %799 = vmatpush3.bf16.msra.mxu1 %v807_v9 }
  0x22   :  { %753 = vmatmul.mubr.bf16.vlgmr.msra.gmra.mxu0 %v810_v10  ;;  %769 = vmatmul.mubr.bf16.vlgmr.msra.gmra.mxu1 %v811_v11 }
  0x23   :  { %756 = vmatprep.mubr.bf16.mxu0 %v812_v12  ;;  %772 = vmatprep.mubr.bf16.mxu1 %v813_v13 }
  0x2a   :  { %757 = vmatmul.mubr.bf16.gmra.mxu0 %v814_v14  ;;  %773 = vmatmul.mubr.bf16.gmra.mxu1 %v815_v15 }
  0x2b   :  { %760 = vmatprep.mubr.bf16.mxu0 %v816_v16  ;;  %776 = vmatprep.mubr.bf16.mxu1 %v817_v17 }
  0x32   :  { %761 = vmatmul.mubr.bf16.gmra.mxu0 %v818_v18  ;;  %777 = vmatmul.mubr.bf16.gmra.mxu1 %v819_v19 }
  0x33   :  { %764 = vmatprep.mubr.bf16.mxu0 %v820_v20  ;;  %780 = vmatprep.mubr.bf16.mxu1 %v821_v21 }
  0x3a   :  { %765 = vmatmul.mubr.bf16.gmra.mxu0 %v822_v22  ;;  %781 = vmatmul.mubr.bf16.gmra.mxu1 %v823_v23 }
  0xe2   :  { %v754_v24 = vpop.f32.mrf.mxu0  ;;  %v770_v25 = vpop.f32.mrf.mxu1 }
  0xe4   :  { %v238_v26 = vpop.f32.mrf.mxu0  ;;  %v302_v27 = vpop.f32.mrf.mxu1 }
  0xe6   :  { %v755_v28 = vpop.f32.mrf.mxu0  ;;  %v771_v29 = vpop.f32.mrf.mxu1 }
  0xe7   :  { %v625_v30 = vpack.c.bf16 %v755_v28, %v754_v24  ;;  %v665_v31 = vpack.c.bf16 %v771_v29, %v770_v25 }
  0xe8   :  { %v241_v32 = vpop.f32.mrf.mxu0  ;;  %v305_v33 = vpop.f32.mrf.mxu1 }
  0xe9   :  { %697 = vst [vmem:[%s961_s2 + $0x8] sm:$0xff] %v625_v30   ;;  %705 = vst [vmem:[%s961_s2 + $0x48] sm:$0xff] %v665_v31   ;;  %v620_v34 = vpack.c.bf16 %v241_v32, %v238_v26  ;;  %v660_v35 = vpack.c.bf16 %v305_v33, %v302_v27 }
  0xea   :  { %v758_v36 = vpop.f32.mrf.mxu0  ;;  %v774_v37 = vpop.f32.mrf.mxu1 }
  0xeb   :  { %621 = vst [vmem:[%s961_s2] sm:$0xff] %v620_v34   ;;  %704 = vst [vmem:[%s961_s2 + $0x40] sm:$0xff] %v660_v35  }
  0xec   :  { %v254_v38 = vpop.f32.mrf.mxu0  ;;  %v318_v39 = vpop.f32.mrf.mxu1 }
  0xee   :  { %v759_v40 = vpop.f32.mrf.mxu0  ;;  %v775_v41 = vpop.f32.mrf.mxu1 }
  0xef   :  { %v635_v42 = vpack.c.bf16 %v759_v40, %v758_v36  ;;  %v675_v43 = vpack.c.bf16 %v775_v41, %v774_v37 }
  0xf0   :  { %v257_v44 = vpop.f32.mrf.mxu0  ;;  %v321_v45 = vpop.f32.mrf.mxu1 }
  0xf1   :  { %699 = vst [vmem:[%s961_s2 + $0x18] sm:$0xff] %v635_v42   ;;  %707 = vst [vmem:[%s961_s2 + $0x58] sm:$0xff] %v675_v43   ;;  %v630_v46 = vpack.c.bf16 %v257_v44, %v254_v38  ;;  %v670_v47 = vpack.c.bf16 %v321_v45, %v318_v39 }
  0xf2   :  { %v762_v48 = vpop.f32.mrf.mxu0  ;;  %v778_v49 = vpop.f32.mrf.mxu1 }
  0xf3   :  { %698 = vst [vmem:[%s961_s2 + $0x10] sm:$0xff] %v630_v46   ;;  %706 = vst [vmem:[%s961_s2 + $0x50] sm:$0xff] %v670_v47  }
  0xf4   :  { %v270_v50 = vpop.f32.mrf.mxu0  ;;  %v334_v51 = vpop.f32.mrf.mxu1 }
  0xf6   :  { %v763_v52 = vpop.f32.mrf.mxu0  ;;  %v779_v53 = vpop.f32.mrf.mxu1 }
  0xf7   :  { %v645_v54 = vpack.c.bf16 %v763_v52, %v762_v48  ;;  %v685_v55 = vpack.c.bf16 %v779_v53, %v778_v49 }
  0xf8   :  { %v273_v56 = vpop.f32.mrf.mxu0  ;;  %v337_v57 = vpop.f32.mrf.mxu1 }
  0xf9   :  { %701 = vst [vmem:[%s961_s2 + $0x28] sm:$0xff] %v645_v54   ;;  %709 = vst [vmem:[%s961_s2 + $0x68] sm:$0xff] %v685_v55   ;;  %v640_v58 = vpack.c.bf16 %v273_v56, %v270_v50  ;;  %v680_v59 = vpack.c.bf16 %v337_v57, %v334_v51 }
  0xfa   :  { %v766_v60 = vpop.f32.mrf.mxu0  ;;  %v782_v61 = vpop.f32.mrf.mxu1 }
  0xfb   :  { %700 = vst [vmem:[%s961_s2 + $0x20] sm:$0xff] %v640_v58   ;;  %708 = vst [vmem:[%s961_s2 + $0x60] sm:$0xff] %v680_v59  }
  0xfc   :  { %v286_v62 = vpop.f32.mrf.mxu0  ;;  %v350_v63 = vpop.f32.mrf.mxu1 }
  0xfe   :  { %v767_v0 = vpop.f32.mrf.mxu0  ;;  %v783_v1 = vpop.f32.mrf.mxu1 }
  0xff   :  { %v655_v2 = vpack.c.bf16 %v767_v0, %v766_v60  ;;  %v695_v3 = vpack.c.bf16 %v783_v1, %v782_v61 }
 0x100   :  { %v289_v4 = vpop.f32.mrf.mxu0  ;;  %v353_v5 = vpop.f32.mrf.mxu1 }
 0x101   :  { %703 = vst [vmem:[%s961_s2 + $0x38] sm:$0xff] %v655_v2   ;;  %711 = vst [vmem:[%s961_s2 + $0x78] sm:$0xff] %v695_v3   ;;  %v650_v6 = vpack.c.bf16 %v289_v4, %v286_v62  ;;  %v690_v7 = vpack.c.bf16 %v353_v5, %v350_v63 }
 0x103   :  { %702 = vst [vmem:[%s961_s2 + $0x30] sm:$0xff] %v650_v6   ;;  %710 = vst [vmem:[%s961_s2 + $0x70] sm:$0xff] %v690_v7  }

// kernel: gan_cmp_d_forward.7
= control target key start
LH: loop header
LB: loop body
LE: loop exit
PB: predicated region body
PF: predicated region fallthrough
CT: control target
= control target key end

     0   :  { %s2245_s21 = smov 0   ;;  %s2727_s0 = inlined_call_operand.vmem [shape: bf16[4,64,128], index: 0, kind: input, shape index: {}]   ;;  %s2728_s1 = inlined_call_operand.vmem [shape: f32[128,4], index: 1, kind: input, shape index: {}]   ;;  %s2729_s2 = inlined_call_operand.vmem [shape: bf16[128,128], index: 2, kind: input, shape index: {}]   ;;  %s2730_s3 = inlined_call_operand.vmem [shape: bf16[128,128], index: 3, kind: input, shape index: {}]   ;;  %s2731_s4 = inlined_call_operand.vmem [shape: bf16[128,128], index: 4, kind: input, shape index: {}]   ;;  %s2732_s5 = inlined_call_operand.vmem [shape: bf16[128,128], index: 5, kind: input, shape index: {}]   ;;  %s2733_s6 = inlined_call_operand.vmem [shape: bf16[4,64,128], index: 6, kind: output, shape index: {}]  }
   0x1 LB: > { %s1583_s22 = sadd.s32 4294967295, %s2206_s21   ;;  %p1587_p0 = scmp.ge.s32.totalorder %s2206_s21, 1  ;;  %s2206_s21 = sphi %s2245_s21, %s16_s21  }
   0x2   : > { %p212_p1 = scmp.lt.s32.totalorder %s2206_s21, 5 }
   0x4   : > { %p213_p2 = pnand %p1587_p0, %p212_p1 }
   0x5   : > { %p242_p3 = scmp.lt.s32.totalorder (!%p213_p2), %s1583_s22, 3 }
   0x6   : > { %216 = sbr.rel (%p213_p2) target bundleno = 1637 (0x665), region = 44 }
   0xb   : > { %v2256_v0 = vld [vmem:[%s2728_s1 + $0x78] sm:$0xff]  ;;  %v2208_v1 = vmov 0.0   ;;  %v2263_v2 = vld [vmem:[%s2728_s1 + $0x70] sm:$0xff]  ;;  %s2735_s22 = smov (!%p242_p3, %s1583_s22), 3  ;;  %v2274_v3 = vld [vmem:[%s2728_s1 + $0x68] sm:$0xff]  ;;  %vm2209_vm0 = vmmov 0  }
   0xc   : > { %1856 = vmatprep.subr.mxu0 %v2208_v1  ;;  %1891 = vmatprep.subr.mxu1 %v2208_v1  ;;  %s1672_s29 = sshll.u32 %s2735_s22, 5  ;;  %v2284_v4 = vld [vmem:[%s2728_s1 + $0x60] sm:$0xff]  ;;  %v2296_v5 = vld [vmem:[%s2728_s1 + $0x58] sm:$0xff]  ;;  %v2303_v8 = vld [vmem:[%s2728_s1 + $0x50] sm:$0xff]  ;;  %vm466_vm1 = vcmask 31744   ;;  %vm1173_vm10 = vcmask 523264  }
   0xd   : > { %1857 = vmatpush3.msra.mxu0 %v2256_v0  ;;  %1892 = vmatpush3.msra.mxu1 %v2256_v0  ;;  %s246_s10 = scalar_lea.vmem %s2727_s0, %s1672_s29  ;;  %v2320_v14 = vld [vmem:[%s2728_s1 + $0x48] sm:$0xff]  ;;  %v2339_v21 = vld [vmem:[%s2728_s1 + $0x40] sm:$0xff]  ;;  %v2353_v26 = vld [vmem:[%s2728_s1 + $0x38] sm:$0xff]  ;;  %s251_s17 = scalar_lea.vmem %s2733_s6, %s1672_s29 }
   0xe   : > { %1858 = vmatprep.subr.mxu0 %v2208_v1  ;;  %1893 = vmatprep.subr.mxu1 %v2208_v1  ;;  %v1683_v6 = vld [vmem:[%s246_s10] sm:$0xff]   ;;  %v1718_v7 = vld [vmem:[%s246_s10 + $0x8] sm:$0xff]   ;;  %v1719_v12 = vld [vmem:[%s246_s10 + $0x10] sm:$0xff]  }
   0xf   : > { %1859 = vmatpush3.msra.mxu0 %v2263_v2  ;;  %1894 = vmatpush3.msra.mxu1 %v2263_v2  ;;  %v2305_v9 = vunpack.c.l.bf16 %v1683_v6  ;;  %v2307_v10 = vunpack.c.h.bf16 %v1683_v6  ;;  %v2309_v11 = vunpack.c.l.bf16 %v1718_v7  ;;  %v2313_v13 = vunpack.c.h.bf16 %v1718_v7  ;;  %v1720_v15 = vld [vmem:[%s246_s10 + $0x18] sm:$0xff]   ;;  %v2367_v31 = vld [vmem:[%s2728_s1 + $0x30] sm:$0xff]  ;;  %v2381_v36 = vld [vmem:[%s2728_s1 + $0x28] sm:$0xff] }
  0x10   : > { %1860 = vmatprep.subr.mxu0 %v2208_v1  ;;  %1895 = vmatprep.subr.mxu1 %v2208_v1  ;;  %v2330_v19 = vunpack.c.l.bf16 %v1719_v12  ;;  %v2344_v23 = vunpack.c.h.bf16 %v1719_v12  ;;  %v2358_v28 = vunpack.c.l.bf16 %v1720_v15  ;;  %v2372_v33 = vunpack.c.h.bf16 %v1720_v15  ;;  %v2393_v40 = vld [vmem:[%s2728_s1 + $0x20] sm:$0xff]  ;;  %v2405_v44 = vld [vmem:[%s2728_s1 + $0x18] sm:$0xff]  ;;  %v2415_v47 = vld [vmem:[%s2728_s1 + $0x10] sm:$0xff] }
  0x11   : > { %1861 = vmatpush3.msra.mxu0 %v2274_v3  ;;  %1896 = vmatpush3.msra.mxu1 %v2274_v3  ;;  %v285_v16 = vadd.f32 %v2307_v10, %v2305_v9  ;;  %v298_v17 = vmul.f32 %v2305_v9, %v2305_v9  ;;  %v299_v18 = vmul.f32 %v2307_v10, %v2307_v10  ;;  %v2428_v52 = vld [vmem:[%s2728_s1 + $0x8] sm:$0xff]  ;;  %v2437_v55 = vld [vmem:[%s2728_s1] sm:$0xff]  ;;  %v2135_v15 = vld [vmem:[%s2730_s3 + $0x38] sm:$0xff]  }
  0x12   : > { %1862 = vmatprep.subr.mxu0 %v2208_v1  ;;  %1897 = vmatprep.subr.mxu1 %v2208_v1  ;;  %v300_v20 = vmul.f32 %v2309_v11, %v2309_v11  ;;  %v301_v24 = vmul.f32 %v2313_v13, %v2313_v13  ;;  %v302_v29 = vmul.f32 %v2330_v19, %v2330_v19 }
  0x13   : > { %1863 = vmatpush3.msra.mxu0 %v2284_v4  ;;  %1898 = vmatpush3.msra.mxu1 %v2284_v4  ;;  %v286_v22 = vadd.f32 %v2309_v11, %v285_v16  ;;  %v306_v25 = vadd.f32 %v299_v18, %v298_v17  ;;  %v303_v34 = vmul.f32 %v2344_v23, %v2344_v23  ;;  %v2136_v16 = vld [vmem:[%s2729_s2 + $0x30] sm:$0xff]   ;;  %v2138_v18 = vld [vmem:[%s2729_s2 + $0x28] sm:$0xff]  }
  0x14   : > { %1864 = vmatprep.subr.mxu0 %v2208_v1  ;;  %1899 = vmatprep.subr.mxu1 %v2208_v1  ;;  %v304_v38 = vmul.f32 %v2358_v28, %v2358_v28  ;;  %v305_v42 = vmul.f32 %v2372_v33, %v2372_v33  ;;  %v2137_v17 = vld [vmem:[%s2730_s3 + $0x30] sm:$0xff]  }
  0x15   : > { %1865 = vmatpush3.msra.mxu0 %v2296_v5  ;;  %1900 = vmatpush3.msra.mxu1 %v2296_v5  ;;  %v287_v27 = vadd.f32 %v2313_v13, %v286_v22  ;;  %v307_v30 = vadd.f32 %v306_v25, %v300_v20  ;;  %v2139_v20 = vld [vmem:[%s2730_s3 + $0x28] sm:$0xff]   ;;  %v2141_v22 = vld [vmem:[%s2730_s3 + $0x20] sm:$0xff]   ;;  %v2143_v25 = vld [vmem:[%s2730_s3 + $0x18] sm:$0xff]  }
  0x16   : > { %1866 = vmatprep.subr.mxu0 %v2208_v1  ;;  %1901 = vmatprep.subr.mxu1 %v2208_v1 }
  0x17   : > { %1867 = vmatpush3.msra.mxu0 %v2303_v8  ;;  %1902 = vmatpush3.msra.mxu1 %v2303_v8  ;;  %v288_v32 = vadd.f32 %v2330_v19, %v287_v27  ;;  %v308_v35 = vadd.f32 %v307_v30, %v301_v24  ;;  %v2142_v24 = vld [vmem:[%s2729_s2 + $0x18] sm:$0xff]   ;;  %v2145_v27 = vld [vmem:[%s2730_s3 + $0x10] sm:$0xff]   ;;  %v2147_v30 = vld [vmem:[%s2730_s3 + $0x8] sm:$0xff]  }
  0x18   : > { %1868 = vmatprep.subr.mxu0 %v2208_v1  ;;  %1903 = vmatprep.subr.mxu1 %v2208_v1 }
  0x19   : > { %1869 = vmatpush3.msra.mxu0 %v2320_v14  ;;  %1904 = vmatpush3.msra.mxu1 %v2320_v14  ;;  %v289_v37 = vadd.f32 %v2344_v23, %v288_v32  ;;  %v309_v39 = vadd.f32 %v308_v35, %v302_v29  ;;  %v2146_v29 = vld [vmem:[%s2729_s2 + $0x8] sm:$0xff]   ;;  %v2149_v32 = vld [vmem:[%s2730_s3] sm:$0xff]  }
  0x1a   : > { %1870 = vmatprep.subr.mxu0 %v2208_v1  ;;  %1905 = vmatprep.subr.mxu1 %v2208_v1 }
  0x1b   : > { %1871 = vmatpush3.msra.mxu0 %v2339_v21  ;;  %1906 = vmatpush3.msra.mxu1 %v2339_v21  ;;  %v290_v41 = vadd.f32 %v2358_v28, %v289_v37  ;;  %v310_v43 = vadd.f32 %v309_v39, %v303_v34  ;;  %v2150_v34 = vld [vmem:[%s2731_s4 + $0x38] sm:$0xff]   ;;  %v661_v37 = vlaneseq }
  0x1c   : > { %1872 = vmatprep.subr.mxu0 %v2208_v1  ;;  %1907 = vmatprep.subr.mxu1 %v2208_v1 }
  0x1d   : > { %1873 = vmatpush3.msra.mxu0 %v2353_v26  ;;  %1908 = vmatpush3.msra.mxu1 %v2353_v26  ;;  %v291_v45 = vadd.f32 %v2372_v33, %v290_v41  ;;  %v311_v46 = vadd.f32 %v310_v43, %v304_v38  ;;  %v662_v38 = vshrl.u32 %v661_v37, 7 }
  0x1e   : > { %1874 = vmatprep.subr.mxu0 %v2208_v1  ;;  %1909 = vmatprep.subr.mxu1 %v2208_v1 }
  0x1f   : > { %1875 = vmatpush3.msra.mxu0 %v2367_v31  ;;  %1910 = vmatpush3.msra.mxu1 %v2367_v31  ;;  %v292_v48 = vrot.slane %v291_v45, 4  ;;  %v312_v49 = vadd.f32 %v311_v46, %v305_v42  ;;  %v663_v39 = vsub.s32 0, %v662_v38 }
  0x20   : > { %1876 = vmatprep.subr.mxu0 %v2208_v1  ;;  %1911 = vmatprep.subr.mxu1 %v2208_v1 }
  0x21   : > { %1877 = vmatpush3.msra.mxu0 %v2381_v36  ;;  %1912 = vmatpush3.msra.mxu1 %v2381_v36  ;;  %v293_v50 = vadd.f32 %v292_v48, %v291_v45  ;;  %v313_v51 = vrot.slane %v312_v49, 4 }
  0x22   : > { %1878 = vmatprep.subr.mxu0 %v2208_v1  ;;  %1913 = vmatprep.subr.mxu1 %v2208_v1 }
  0x23   : > { %1879 = vmatpush3.msra.mxu0 %v2393_v40  ;;  %1914 = vmatpush3.msra.mxu1 %v2393_v40  ;;  %v294_v53 = vrot.slane %v293_v50, 2  ;;  %v314_v54 = vadd.f32 %v313_v51, %v312_v49 }
  0x24   : > { %1880 = vmatprep.subr.mxu0 %v2208_v1  ;;  %1915 = vmatprep.subr.mxu1 %v2208_v1 }
  0x25   : > { %1881 = vmatpush3.msra.mxu0 %v2405_v44  ;;  %1916 = vmatpush3.msra.mxu1 %v2405_v44  ;;  %v295_v56 = vadd.f32 %v294_v53, %v293_v50  ;;  %v315_v57 = vrot.slane %v314_v54, 2 }
  0x26   : > { %1882 = vmatprep.subr.mxu0 %v2208_v1  ;;  %1917 = vmatprep.subr.mxu1 %v2208_v1 }
  0x27   : > { %1883 = vmatpush3.msra.mxu0 %v2415_v47  ;;  %1918 = vmatpush3.msra.mxu1 %v2415_v47  ;;  %v296_v58 = vrot.slane %v295_v56, 1  ;;  %v316_v59 = vadd.f32 %v315_v57, %v314_v54 }
  0x28   : > { %1884 = vmatprep.subr.mxu0 %v2208_v1  ;;  %1919 = vmatprep.subr.mxu1 %v2208_v1 }
  0x29   : > { %1885 = vmatpush3.msra.mxu0 %v2428_v52  ;;  %1888 = vmatprep.mubr.msk.f32.mxu0 %vm2209_vm0, %v2208_v1  ;;  %v297_v60 = vadd.f32 %v296_v58, %v295_v56  ;;  %v317_v61 = vrot.slane %v316_v59, 1 }
  0x2a   : > { %1886 = vmatprep.subr.mxu0 %v2208_v1  ;;  %1920 = vmatpush3.msra.mxu1 %v2428_v52 }
  0x2b   : > { %1887 = vmatpush3.msra.mxu0 %v2437_v55  ;;  %1921 = vmatprep.subr.mxu1 %v2208_v1  ;;  %v318_v62 = vadd.f32 %v317_v61, %v316_v59 }
  0x2c   : > { %1922 = vmatpush3.msra.mxu1 %v2437_v55  ;;  %1923 = vmatprep.mubr.msk.f32.mxu1 %vm2209_vm0, %v2208_v1 }
  0x2d   : > { %1926 = vmatprep.subr.mxu0 %v2208_v1  ;;  %1961 = vmatprep.subr.mxu1 %v2208_v1 }
  0x2e   : > { %1889 = vmatmul.mubr.f32.vlgmr.msra.gmra.mxu0 %v297_v60  ;;  %1924 = vmatmul.mubr.f32.vlgmr.msra.gmra.mxu1 %v318_v62 }
  0x2f   : > { %1927 = vmatpush3.xpose.msk.msra.mxu0 %vm466_vm1, %v2256_v0  ;;  %1958 = vmatprep.mubr.msk.f32.mxu0 %vm2209_vm0, %v2208_v1 }
  0x30   : > { %1928 = vmatprep.subr.mxu0 %v2208_v1  ;;  %1962 = vmatpush3.xpose.msk.msra.mxu1 %vm466_vm1, %v2256_v0 }
  0x31   : > { %1993 = vmatprep.mubr.msk.f32.mxu1 %vm2209_vm0, %v2208_v1  ;;  %1963 = vmatprep.subr.mxu1 %v2208_v1 }
  0x33   : > { %1929 = vmatpush3.xpose.msk.msra.mxu0 %vm466_vm1, %v2263_v2 }
  0x34   : > { %1930 = vmatprep.subr.mxu0 %v2208_v1  ;;  %1964 = vmatpush3.xpose.msk.msra.mxu1 %vm466_vm1, %v2263_v2 }
  0x35   : > { %1965 = vmatprep.subr.mxu1 %v2208_v1 }
  0x37   : > { %1931 = vmatpush3.xpose.msk.msra.mxu0 %vm466_vm1, %v2274_v3 }
  0x38   : > { %1932 = vmatprep.subr.mxu0 %v2208_v1  ;;  %1966 = vmatpush3.xpose.msk.msra.mxu1 %vm466_vm1, %v2274_v3 }
  0x39   : > { %1967 = vmatprep.subr.mxu1 %v2208_v1 }
  0x3b   : > { %1933 = vmatpush3.xpose.msk.msra.mxu0 %vm466_vm1, %v2284_v4 }
  0x3c   : > { %1934 = vmatprep.subr.mxu0 %v2208_v1  ;;  %1968 = vmatpush3.xpose.msk.msra.mxu1 %vm466_vm1, %v2284_v4 }
  0x3d   : > { %1969 = vmatprep.subr.mxu1 %v2208_v1 }
  0x3f   : > { %1935 = vmatpush3.xpose.msk.msra.mxu0 %vm466_vm1, %v2296_v5 }
  0x40   : > { %1936 = vmatprep.subr.mxu0 %v2208_v1  ;;  %1970 = vmatpush3.xpose.msk.msra.mxu1 %vm466_vm1, %v2296_v5 }
  0x41   : > { %1971 = vmatprep.subr.mxu1 %v2208_v1 }
  0x43   : > { %1937 = vmatpush3.xpose.msk.msra.mxu0 %vm466_vm1, %v2303_v8 }
  0x44   : > { %1938 = vmatprep.subr.mxu0 %v2208_v1  ;;  %1972 = vmatpush3.xpose.msk.msra.mxu1 %vm466_vm1, %v2303_v8 }
  0x45   : > { %1973 = vmatprep.subr.mxu1 %v2208_v1 }
  0x47   : > { %1939 = vmatpush3.xpose.msk.msra.mxu0 %vm466_vm1, %v2320_v14 }
  0x48   : > { %1940 = vmatprep.subr.mxu0 %v2208_v1  ;;  %1974 = vmatpush3.xpose.msk.msra.mxu1 %vm466_vm1, %v2320_v14 }
  0x49   : > { %1975 = vmatprep.subr.mxu1 %v2208_v1 }
  0x4b   : > { %1941 = vmatpush3.xpose.msk.msra.mxu0 %vm466_vm1, %v2339_v21 }
  0x4c   : > { %1942 = vmatprep.subr.mxu0 %v2208_v1  ;;  %1976 = vmatpush3.xpose.msk.msra.mxu1 %vm466_vm1, %v2339_v21  ;;  %v2140_v21 = vld [vmem:[%s2729_s2 + $0x20] sm:$0xff]  }
  0x4d   : > { %1977 = vmatprep.subr.mxu1 %v2208_v1 }
  0x4f   : > { %1943 = vmatpush3.xpose.msk.msra.mxu0 %vm466_vm1, %v2353_v26 }
  0x50   : > { %1944 = vmatprep.subr.mxu0 %v2208_v1  ;;  %1978 = vmatpush3.xpose.msk.msra.mxu1 %vm466_vm1, %v2353_v26  ;;  %v2144_v26 = vld [vmem:[%s2729_s2 + $0x10] sm:$0xff]  }
  0x51   : > { %1979 = vmatprep.subr.mxu1 %v2208_v1 }
  0x53   : > { %1945 = vmatpush3.xpose.msk.msra.mxu0 %vm466_vm1, %v2367_v31 }
  0x54   : > { %1946 = vmatprep.subr.mxu0 %v2208_v1  ;;  %1980 = vmatpush3.xpose.msk.msra.mxu1 %vm466_vm1, %v2367_v31  ;;  %v2148_v31 = vld [vmem:[%s2729_s2] sm:$0xff]  }
  0x55   : > { %1981 = vmatprep.subr.mxu1 %v2208_v1 }
  0x57   : > { %1947 = vmatpush3.xpose.msk.msra.mxu0 %vm466_vm1, %v2381_v36 }
  0x58   : > { %1948 = vmatprep.subr.mxu0 %v2208_v1  ;;  %1982 = vmatpush3.xpose.msk.msra.mxu1 %vm466_vm1, %v2381_v36 }
  0x59   : > { %1983 = vmatprep.subr.mxu1 %v2208_v1 }
  0x5b   : > { %1949 = vmatpush3.xpose.msk.msra.mxu0 %vm466_vm1, %v2393_v40 }
  0x5c   : > { %1950 = vmatprep.subr.mxu0 %v2208_v1  ;;  %1984 = vmatpush3.xpose.msk.msra.mxu1 %vm466_vm1, %v2393_v40 }
  0x5d   : > { %1985 = vmatprep.subr.mxu1 %v2208_v1 }
  0x5f   : > { %1951 = vmatpush3.xpose.msk.msra.mxu0 %vm466_vm1, %v2405_v44 }
  0x60   : > { %1952 = vmatprep.subr.mxu0 %v2208_v1  ;;  %1986 = vmatpush3.xpose.msk.msra.mxu1 %vm466_vm1, %v2405_v44 }
  0x61   : > { %1987 = vmatprep.subr.mxu1 %v2208_v1 }
  0x63   : > { %1953 = vmatpush3.xpose.msk.msra.mxu0 %vm466_vm1, %v2415_v47 }
  0x64   : > { %1954 = vmatprep.subr.mxu0 %v2208_v1  ;;  %1988 = vmatpush3.xpose.msk.msra.mxu1 %vm466_vm1, %v2415_v47 }
  0x65   : > { %1989 = vmatprep.subr.mxu1 %v2208_v1 }
  0x67   : > { %1955 = vmatpush3.xpose.msk.msra.mxu0 %vm466_vm1, %v2428_v52 }
  0x68   : > { %1956 = vmatprep.subr.mxu0 %v2208_v1  ;;  %1990 = vmatpush3.xpose.msk.msra.mxu1 %vm466_vm1, %v2428_v52 }
  0x69   : > { %1991 = vmatprep.subr.mxu1 %v2208_v1  ;;  %v2134_v1 = vld [vmem:[%s2729_s2 + $0x38] sm:$0xff]  }
  0x6b   : > { %1957 = vmatpush3.xpose.msk.msra.mxu0 %vm466_vm1, %v2437_v55 }
  0x6c   : > { %1992 = vmatpush3.xpose.msk.msra.mxu1 %vm466_vm1, %v2437_v55  ;;  %1996 = vmatprep.subr.bf16.mxu0 %v2134_v1 }
  0x6d   : > { %2020 = vmatprep.subr.bf16.mxu1 %v2135_v15 }
  0xee   : > { %v385_v63 = vpop.f32.mrf.mxu0  ;;  %v456_v4 = vpop.f32.mrf.mxu1 }
  0xef   : > { %v389_v0 = vmul.f32 0.00390625, %v385_v63  ;;  %v460_v5 = vmul.f32 0.00390625, %v456_v4 }
  0xf0   : > { %v1890_v2 = vpop.f32.mrf.mxu0  ;;  %v1925_v6 = vpop.f32.mrf.mxu1 }
  0xf1   : > { %v461_v3 = vmul.f32 %v389_v0, %v389_v0  ;;  %1959 = vmatmul.mubr.msk.f32.vlgmr.msra.gmra.mxu0 %vm466_vm1, %v389_v0  ;;  %v2151_v0 = vld [vmem:[%s2731_s4 + $0x30] sm:$0xff]  }
  0xf2   : > { %1997 = vmatpush3.bf16.msra.mxu0 %v2134_v1  ;;  %v2153_v1 = vld [vmem:[%s2731_s4 + $0x20] sm:$0xff]  }
  0xf3   : > { %v462_v7 = vsub.f32 %v460_v5, %v461_v3  ;;  %1998 = vmatprep.subr.bf16.mxu0 %v2136_v16 }
  0xf5   : > { %v463_v8 = vmax.f32 %v462_v7, 0.0  ;;  %v2152_v7 = vld [vmem:[%s2731_s4 + $0x28] sm:$0xff]  }
  0xf6   : > { %1999 = vmatpush3.bf16.msra.mxu0 %v2136_v16  ;;  %v2155_v16 = vld [vmem:[%s2731_s4 + $0x10] sm:$0xff]  }
  0xf7   : > { %v464_v12 = vadd.f32 1e-05, %v463_v8  ;;  %2000 = vmatprep.subr.bf16.mxu0 %v2138_v18 }
  0xf9   : > { %2166 = vrsqrt.f32 %v464_v12 }
  0xfa   : > { %2001 = vmatpush3.bf16.msra.mxu0 %v2138_v18  ;;  %v2157_v18 = vld [vmem:[%s2731_s4] sm:$0xff]  }
  0xfb   : > { %2002 = vmatprep.subr.bf16.mxu0 %v2140_v21 }
  0xfe   : > { %2003 = vmatpush3.bf16.msra.mxu0 %v2140_v21 }
  0xff   : > { %2004 = vmatprep.subr.bf16.mxu0 %v2142_v24 }
 0x102   : > { %2005 = vmatpush3.bf16.msra.mxu0 %v2142_v24 }
 0x103   : > { %2006 = vmatprep.subr.bf16.mxu0 %v2144_v26 }
 0x106   : > { %v2167_v14 = vpop.eup %2166  ;;  %2007 = vmatpush3.bf16.msra.mxu0 %v2144_v26 }
 0x107   : > { %1994 = vmatmul.mubr.msk.f32.vlgmr.msra.gmra.mxu1 %vm466_vm1, %v2167_v14  ;;  %2008 = vmatprep.subr.bf16.mxu0 %v2146_v29 }
 0x108   : > { %2021 = vmatpush3.bf16.msra.mxu1 %v2135_v15  ;;  %v2154_v15 = vld [vmem:[%s2731_s4 + $0x18] sm:$0xff]  }
 0x109   : > { %2022 = vmatprep.subr.bf16.mxu1 %v2137_v17 }
 0x10a   : > { %2009 = vmatpush3.bf16.msra.mxu0 %v2146_v29 }
 0x10b   : > { %2010 = vmatprep.subr.bf16.mxu0 %v2148_v31 }
 0x10c   : > { %2023 = vmatpush3.bf16.msra.mxu1 %v2137_v17  ;;  %v2156_v17 = vld [vmem:[%s2731_s4 + $0x8] sm:$0xff]  }
 0x10d   : > { %2024 = vmatprep.subr.bf16.mxu1 %v2139_v20 }
 0x10e   : > { %2011 = vmatpush3.bf16.msra.mxu0 %v2148_v31 }
 0x10f   : > { %2044 = vmatprep.subr.bf16.mxu0 %v2150_v34 }
 0x110   : > { %2025 = vmatpush3.bf16.msra.mxu1 %v2139_v20 }
 0x111   : > { %2026 = vmatprep.subr.bf16.mxu1 %v2141_v22 }
 0x114   : > { %2027 = vmatpush3.bf16.msra.mxu1 %v2141_v22 }
 0x115   : > { %2028 = vmatprep.subr.bf16.mxu1 %v2143_v25 }
 0x118   : > { %2029 = vmatpush3.bf16.msra.mxu1 %v2143_v25 }
 0x119   : > { %2030 = vmatprep.subr.bf16.mxu1 %v2145_v27 }
 0x11c   : > { %2031 = vmatpush3.bf16.msra.mxu1 %v2145_v27 }
 0x11d   : > { %2032 = vmatprep.subr.bf16.mxu1 %v2147_v30 }
 0x120   : > { %2033 = vmatpush3.bf16.msra.mxu1 %v2147_v30 }
 0x121   : > { %2034 = vmatprep.subr.bf16.mxu1 %v2149_v32 }
 0x124   : > { %2035 = vmatpush3.bf16.msra.mxu1 %v2149_v32 }
 0x1b1   : > { %v584_v35 = vpop.f32.mrf.mxu0 }
 0x1b2   : > { %v664_v40 = vrot.slane %v584_v35, %v663_v39 }
 0x1b3   : > { %v1960_v36 = vpop.f32.mrf.mxu0 }
 0x1b4   : > { %v665_v42 = vsub.f32 %v2305_v9, %v664_v40  ;;  %v666_v44 = vsub.f32 %v2307_v10, %v664_v40  ;;  %v667_v45 = vsub.f32 %v2309_v11, %v664_v40  ;;  %v668_v46 = vsub.f32 %v2313_v13, %v664_v40 }
 0x1b5   : > { %v669_v48 = vsub.f32 %v2330_v19, %v664_v40  ;;  %v670_v49 = vsub.f32 %v2344_v23, %v664_v40  ;;  %v671_v50 = vsub.f32 %v2358_v28, %v664_v40  ;;  %v672_v51 = vsub.f32 %v2372_v33, %v664_v40 }
 0x1c7   : > { %v657_v41 = vpop.f32.mrf.mxu1 }
 0x1c8   : > { %v676_v43 = vrot.slane %v657_v41, %v663_v39 }
 0x1c9   : > { %v1995_v47 = vpop.f32.mrf.mxu1 }
 0x1ca   : > { %v677_v52 = vmul.f32 %v676_v43, %v665_v42  ;;  %v678_v53 = vmul.f32 %v676_v43, %v666_v44  ;;  %v679_v54 = vmul.f32 %v676_v43, %v667_v45  ;;  %v680_v9 = vmul.f32 %v676_v43, %v668_v46 }
 0x1cb   : > { %v681_v55 = vmul.f32 %v676_v43, %v669_v48  ;;  %v682_v56 = vmul.f32 %v676_v43, %v670_v49  ;;  %v683_v10 = vmul.f32 %v676_v43, %v671_v50  ;;  %v684_v57 = vmul.f32 %v676_v43, %v672_v51 }
 0x1cc   : > { %vm685_vm2 = vcmp.ge.f32.partialorder %v677_v52, 0.0  ;;  %vm686_vm3 = vcmp.ge.f32.partialorder %v678_v53, 0.0  ;;  %v693_v11 = vmul.f32 0.2, %v677_v52  ;;  %v694_v13 = vmul.f32 0.2, %v678_v53 }
 0x1cd   : > { %vm687_vm4 = vcmp.ge.f32.partialorder %v679_v54, 0.0  ;;  %vm688_vm5 = vcmp.ge.f32.partialorder %v680_v9, 0.0  ;;  %v695_v19 = vmul.f32 0.2, %v679_v54  ;;  %v696_v23 = vmul.f32 0.2, %v680_v9 }
 0x1ce   : > { %v2610_v58 = vsel %vm685_vm2, %v677_v52, %v693_v11  ;;  %v2612_v28 = vsel %vm686_vm3, %v678_v53, %v694_v13  ;;  %vm689_vm6 = vcmp.ge.f32.partialorder %v681_v55, 0.0  ;;  %vm690_vm7 = vcmp.ge.f32.partialorder %v682_v56, 0.0 }
 0x1cf   : > { %v709_v33 = vpack.c.bf16 %v2612_v28, %v2610_v58  ;;  %v2616_v59 = vsel %vm687_vm4, %v679_v54, %v695_v19  ;;  %v2618_v60 = vsel %vm688_vm5, %v680_v9, %v696_v23  ;;  %v697_v61 = vmul.f32 0.2, %v681_v55 }
 0x1d0   : > { %v710_v62 = vpack.c.bf16 %v2618_v60, %v2616_v59  ;;  %v698_v63 = vmul.f32 0.2, %v682_v56  ;;  %v699_v3 = vmul.f32 0.2, %v683_v10  ;;  %v700_v4 = vmul.f32 0.2, %v684_v57 }
 0x1d1   : > { %2012 = vmatprep.mubr.bf16.mxu0 %v709_v33  ;;  %2036 = vmatprep.mubr.bf16.mxu1 %v709_v33  ;;  %v2625_v2 = vsel %vm689_vm6, %v681_v55, %v697_v61  ;;  %vm691_vm8 = vcmp.ge.f32.partialorder %v683_v10, 0.0  ;;  %vm692_vm9 = vcmp.ge.f32.partialorder %v684_v57, 0.0 }
 0x1d2   : > { %2013 = vmatmul.mubr.bf16.vlgmr.msra.gmra.mxu0 %v710_v62  ;;  %2037 = vmatmul.mubr.bf16.vlgmr.msra.gmra.mxu1 %v710_v62  ;;  %v2627_v5 = vsel %vm690_vm7, %v682_v56, %v698_v63  ;;  %v2634_v8 = vsel %vm691_vm8, %v683_v10, %v699_v3  ;;  %v2636_v12 = vsel %vm692_vm9, %v684_v57, %v700_v4 }
 0x1d3   : > { %2045 = vmatpush3.bf16.msra.mxu0 %v2150_v34  ;;  %v711_v6 = vpack.c.bf16 %v2627_v5, %v2625_v2  ;;  %v712_v14 = vpack.c.bf16 %v2636_v12, %v2634_v8 }
 0x1d4   : > { %2046 = vmatprep.subr.bf16.mxu0 %v2151_v0 }
 0x1d5   : > { %2016 = vmatprep.mubr.bf16.mxu0 %v711_v6  ;;  %2040 = vmatprep.mubr.bf16.mxu1 %v711_v6 }
 0x1d7   : > { %2047 = vmatpush3.bf16.msra.mxu0 %v2151_v0 }
 0x1d8   : > { %2048 = vmatprep.subr.bf16.mxu0 %v2152_v7 }
 0x1da   : > { %2017 = vmatmul.mubr.bf16.gmra.mxu0 %v712_v14  ;;  %2041 = vmatmul.mubr.bf16.gmra.mxu1 %v712_v14 }
 0x1db   : > { %2049 = vmatpush3.bf16.msra.mxu0 %v2152_v7  ;;  %2060 = vmatprep.mubr.bf16.mxu0 %v709_v33 }
 0x1dc   : > { %2050 = vmatprep.subr.bf16.mxu0 %v2153_v1 }
 0x1df   : > { %2051 = vmatpush3.bf16.msra.mxu0 %v2153_v1 }
 0x1e0   : > { %2052 = vmatprep.subr.bf16.mxu0 %v2154_v15 }
 0x1e3   : > { %2053 = vmatpush3.bf16.msra.mxu0 %v2154_v15 }
 0x1e4   : > { %2054 = vmatprep.subr.bf16.mxu0 %v2155_v16 }
 0x1e7   : > { %2055 = vmatpush3.bf16.msra.mxu0 %v2155_v16 }
 0x1e8   : > { %2056 = vmatprep.subr.bf16.mxu0 %v2156_v17 }
 0x1eb   : > { %2057 = vmatpush3.bf16.msra.mxu0 %v2156_v17 }
 0x1ec   : > { %2058 = vmatprep.subr.bf16.mxu0 %v2157_v18 }
 0x1ef   : > { %2059 = vmatpush3.bf16.msra.mxu0 %v2157_v18 }
 0x1f2   : > { %2061 = vmatmul.mubr.bf16.vlgmr.msra.gmra.mxu0 %v710_v62 }
 0x1f3   : > { %2064 = vmatprep.mubr.bf16.mxu0 %v711_v6 }
 0x1fa   : > { %2065 = vmatmul.mubr.bf16.gmra.mxu0 %v712_v14 }
 0x292   : > { %v2014_v20 = vpop.f32.mrf.mxu0  ;;  %v2038_v21 = vpop.f32.mrf.mxu1 }
 0x294   : > { %v811_v22 = vpop.f32.mrf.mxu0  ;;  %v940_v24 = vpop.f32.mrf.mxu1 }
 0x296   : > { %v2015_v25 = vpop.f32.mrf.mxu0  ;;  %v2039_v26 = vpop.f32.mrf.mxu1 }
 0x297   : > { %v1105_v40 = vpack.c.bf16 %v2039_v26, %v2038_v21  ;;  %v1101_v51 = vpack.c.bf16 %v2015_v25, %v2014_v20 }
 0x298   : > { %v814_v27 = vpop.f32.mrf.mxu0  ;;  %v943_v29 = vpop.f32.mrf.mxu1 }
 0x299   : > { %v1100_v30 = vpack.c.bf16 %v814_v27, %v811_v22  ;;  %v1104_v43 = vpack.c.bf16 %v943_v29, %v940_v24 }
 0x29a   : > { %v2042_v31 = vpop.f32.mrf.mxu1  ;;  %v2018_v38 = vpop.f32.mrf.mxu0 }
 0x29b   : > { %2076 = vmatprep.mubr.bf16.mxu1 %v1100_v30 }
 0x29c   : > { %v956_v32 = vpop.f32.mrf.mxu1  ;;  %v827_v39 = vpop.f32.mrf.mxu0 }
 0x29e   : > { %v2043_v34 = vpop.f32.mrf.mxu1  ;;  %v2019_v41 = vpop.f32.mrf.mxu0 }
 0x29f   : > { %v1107_v35 = vpack.c.bf16 %v2043_v34, %v2042_v31  ;;  %v1103_v56 = vpack.c.bf16 %v2019_v41, %v2018_v38 }
 0x2a0   : > { %v959_v36 = vpop.f32.mrf.mxu1  ;;  %v830_v42 = vpop.f32.mrf.mxu0 }
 0x2a1   : > { %v1106_v37 = vpack.c.bf16 %v959_v36, %v956_v32  ;;  %2068 = vmatprep.subr.bf16.mxu1 %v1107_v35  ;;  %v1102_v53 = vpack.c.bf16 %v830_v42, %v827_v39 }
 0x2a2   : > { %2069 = vmatpush3.bf16.xpose.msra.mxu1 %v1107_v35 }
 0x2a3   : > { %2070 = vmatprep.subr.bf16.mxu1 %v1106_v37 }
 0x2aa   : > { %2071 = vmatpush3.bf16.xpose.msra.mxu1 %v1106_v37 }
 0x2ab   : > { %2072 = vmatprep.subr.bf16.mxu1 %v1105_v40 }
 0x2b2   : > { %v2062_v44 = vpop.f32.mrf.mxu0  ;;  %2073 = vmatpush3.bf16.xpose.msra.mxu1 %v1105_v40 }
 0x2b3   : > { %2074 = vmatprep.subr.bf16.mxu1 %v1104_v43 }
 0x2b4   : > { %v1069_v45 = vpop.f32.mrf.mxu0 }
 0x2b6   : > { %v2063_v46 = vpop.f32.mrf.mxu0 }
 0x2b7   : > { %v1267_v55 = vpack.c.bf16 %v2063_v46, %v2062_v44 }
 0x2b8   : > { %v1072_v47 = vpop.f32.mrf.mxu0 }
 0x2b9   : > { %v1266_v10 = vpack.c.bf16 %v1072_v47, %v1069_v45 }
 0x2ba   : > { %v2066_v48 = vpop.f32.mrf.mxu0  ;;  %2075 = vmatpush3.bf16.xpose.msra.mxu1 %v1104_v43 }
 0x2bc   : > { %v1085_v49 = vpop.f32.mrf.mxu0 }
 0x2be   : > { %v2067_v50 = vpop.f32.mrf.mxu0 }
 0x2bf   : > { %v1269_v52 = vpack.c.bf16 %v2067_v50, %v2066_v48 }
 0x2c0   : > { %v1088_v54 = vpop.f32.mrf.mxu0 }
 0x2c1   : > { %v1268_v9 = vpack.c.bf16 %v1088_v54, %v1085_v49  ;;  %2084 = vmatprep.subr.bf16.mxu0 %v1269_v52  ;;  %2077 = vmatmul.mubr.bf16.vlgmr.msra.gmra.mxu1 %v1101_v51 }
 0x2c2   : > { %2085 = vmatpush3.bf16.msra.mxu0 %v1269_v52  ;;  %2080 = vmatprep.mubr.bf16.mxu1 %v1102_v53 }
 0x2c3   : > { %2086 = vmatprep.subr.bf16.mxu0 %v1268_v9 }
 0x2c6   : > { %2087 = vmatpush3.bf16.msra.mxu0 %v1268_v9 }
 0x2c7   : > { %2088 = vmatprep.subr.bf16.mxu0 %v1267_v55 }
 0x2c9   : > { %2081 = vmatmul.mubr.bf16.gmra.mxu1 %v1103_v56 }
 0x2ca   : > { %2089 = vmatpush3.bf16.msra.mxu0 %v1267_v55 }
 0x2cb   : > { %2090 = vmatprep.subr.bf16.mxu0 %v1266_v10 }
 0x2ce   : > { %2091 = vmatpush3.bf16.msra.mxu0 %v1266_v10 }
 0x381   : > { %v2078_v57 = vpop.f32.mrf.mxu1 }
 0x382   : > { %v1180_v11 = vsel %vm1173_vm10, %v2078_v57, -inf }
 0x383   : > { %1181 = vmax.xlane.f32.xlu1 %v1180_v11  ;;  %v1142_v13 = vpop.f32.mrf.mxu1  ;;  %v2159_v11 = vld [vmem:[%s2732_s5 + $0x30] sm:$0xff]  }
 0x384   : > { %v1174_v19 = vsel %vm1173_vm10, %v1142_v13, -inf }
 0x385   : > { %1175 = vmax.xlane.f32.xlu0 %v1174_v19  ;;  %v2079_v23 = vpop.f32.mrf.mxu1  ;;  %v2161_v19 = vld [vmem:[%s2732_s5 + $0x20] sm:$0xff]  }
 0x386   : > { %v1183_v33 = vsel %vm1173_vm10, %v2079_v23, -inf }
 0x387   : > { %1184 = vmax.xlane.f32.xlu1 %v1183_v33  ;;  %v1145_v61 = vpop.f32.mrf.mxu1  ;;  %v2163_v33 = vld [vmem:[%s2732_s5 + $0x10] sm:$0xff]  }
 0x388   : > { %v1177_v62 = vsel %vm1173_vm10, %v1145_v61, -inf }
 0x389   : > { %1178 = vmax.xlane.f32.xlu0 %v1177_v62  ;;  %v2082_v63 = vpop.f32.mrf.mxu1 }
 0x38a   : > { %v1192_v7 = vsel %vm1173_vm10, %v2082_v63, -inf }
 0x38b   : > { %v1158_v0 = vpop.f32.mrf.mxu1 }
 0x38c   : > { %v1186_v3 = vsel %vm1173_vm10, %v1158_v0, -inf }
 0x38d   : > { %1187 = vmax.xlane.f32.xlu0 %v1186_v3  ;;  %v2083_v4 = vpop.f32.mrf.mxu1 }
 0x38e   : > { %v1195_v1 = vsel %vm1173_vm10, %v2083_v4, -inf }
 0x38f   : > { %v1161_v6 = vpop.f32.mrf.mxu1 }
 0x390   : > { %v1189_v14 = vsel %vm1173_vm10, %v1161_v6, -inf }
 0x391   : > { %1193 = vmax.xlane.f32.xlu0 %v1192_v7  ;;  %1190 = vmax.xlane.f32.xlu1 %v1189_v14 }
 0x395   : > { %1196 = vmax.xlane.f32.xlu1 %v1195_v1 }
 0x40c   : > { %v1182_v15 = vpop.xlane.xlu1 %1181 }
 0x40d   : > { %v1200_v16 = vsub.f32 %v2078_v57, %v1182_v15  ;;  %v2158_v57 = vld [vmem:[%s2732_s5 + $0x38] sm:$0xff]  }
 0x40e   : > { %v1176_v17 = vpop.xlane.xlu0 %1175  ;;  %2100 = vmatprep.subr.bf16.mxu1 %v2158_v57 }
 0x40f   : > { %v1198_v18 = vsub.f32 %v1142_v13, %v1176_v17  ;;  %v1210_v21 = vmul.f32 1.442695, %v1200_v16  ;;  %2101 = vmatpush3.bf16.msra.mxu1 %v2158_v57  ;;  %v2160_v13 = vld [vmem:[%s2732_s5 + $0x28] sm:$0xff]  }
 0x410   : > { %v1185_v20 = vpop.xlane.xlu1 %1184  ;;  %2102 = vmatprep.subr.bf16.mxu1 %v2159_v11 }
 0x411   : > { %v1206_v22 = vmul.f32 1.442695, %v1198_v18  ;;  %v1201_v24 = vsub.f32 %v2079_v23, %v1185_v20  ;;  %v2162_v23 = vld [vmem:[%s2732_s5 + $0x18] sm:$0xff]  }
 0x412   : > { %v1179_v25 = vpop.xlane.xlu0 %1178 }
 0x413   : > { %2168 = vpow2.f32 %v1206_v22  ;;  %v1199_v26 = vsub.f32 %v1145_v61, %v1179_v25  ;;  %v1212_v27 = vmul.f32 1.442695, %v1201_v24  ;;  %2103 = vmatpush3.bf16.msra.mxu1 %v2159_v11 }
 0x414   : > { %2170 = vpow2.f32 %v1210_v21  ;;  %2104 = vmatprep.subr.bf16.mxu1 %v2160_v13 }
 0x415   : > { %v1208_v29 = vmul.f32 1.442695, %v1199_v26 }
 0x416   : > { %v1188_v30 = vpop.xlane.xlu0 %1187 }
 0x417   : > { %2172 = vpow2.f32 %v1208_v29  ;;  %v1202_v31 = vsub.f32 %v1158_v0, %v1188_v30  ;;  %2105 = vmatpush3.bf16.msra.mxu1 %v2160_v13 }
 0x418   : > { %2174 = vpow2.f32 %v1212_v27  ;;  %2106 = vmatprep.subr.bf16.mxu1 %v2161_v19 }
 0x419   : > { %v1214_v32 = vmul.f32 1.442695, %v1202_v31 }
 0x41a   : > { %v1194_v34 = vpop.xlane.xlu0 %1193  ;;  %v1191_v35 = vpop.xlane.xlu1 %1190 }
 0x41b   : > { %2176 = vpow2.f32 %v1214_v32  ;;  %v1204_v36 = vsub.f32 %v2082_v63, %v1194_v34  ;;  %v1203_v37 = vsub.f32 %v1161_v6, %v1191_v35  ;;  %2107 = vmatpush3.bf16.msra.mxu1 %v2161_v19 }
 0x41c   : > { %2108 = vmatprep.subr.bf16.mxu1 %v2162_v23 }
 0x41d   : > { %v1218_v38 = vmul.f32 1.442695, %v1204_v36  ;;  %v1216_v39 = vmul.f32 1.442695, %v1203_v37  ;;  %v2164_v37 = vld [vmem:[%s2732_s5 + $0x8] sm:$0xff]  }
 0x41e   : > { %v1197_v40 = vpop.xlane.xlu1 %1196 }
 0x41f   : > { %2178 = vpow2.f32 %v1218_v38  ;;  %v1205_v41 = vsub.f32 %v2083_v4, %v1197_v40  ;;  %2109 = vmatpush3.bf16.msra.mxu1 %v2162_v23  ;;  %v2165_v38 = vld [vmem:[%s2732_s5] sm:$0xff]  }
 0x420   : > { %v2663_v42 = vpop.eup %2168  ;;  %2180 = vpow2.f32 %v1216_v39  ;;  %2110 = vmatprep.subr.bf16.mxu1 %v2163_v33 }
 0x421   : > { %v1220_v43 = vmul.f32 1.442695, %v1205_v41  ;;  %v1222_v44 = vsel %vm1173_vm10, %v2663_v42, 0.0  ;;  %v2667_v45 = vpop.eup %2170 }
 0x422   : > { %1223 = vadd.xlane.f32.xlu0 %v1222_v44  ;;  %v1228_v47 = vsel %vm1173_vm10, %v2667_v45, 0.0 }
 0x423   : > { %2182 = vpow2.f32 %v1220_v43  ;;  %2111 = vmatpush3.bf16.msra.mxu1 %v2163_v33 }
 0x424   : > { %v2173_v46 = vpop.eup %2172  ;;  %2112 = vmatprep.subr.bf16.mxu1 %v2164_v37 }
 0x425   : > { %v1225_v48 = vsel %vm1173_vm10, %v2173_v46, 0.0  ;;  %v2175_v49 = vpop.eup %2174 }
 0x426   : > { %1229 = vadd.xlane.f32.xlu0 %v1228_v47  ;;  %1226 = vadd.xlane.f32.xlu1 %v1225_v48  ;;  %v1231_v52 = vsel %vm1173_vm10, %v2175_v49, 0.0 }
 0x427   : > { %2113 = vmatpush3.bf16.msra.mxu1 %v2164_v37 }
 0x428   : > { %v2177_v50 = vpop.eup %2176  ;;  %2114 = vmatprep.subr.bf16.mxu1 %v2165_v38 }
 0x429   : > { %v1234_v51 = vsel %vm1173_vm10, %v2177_v50, 0.0 }
 0x42a   : > { %1235 = vadd.xlane.f32.xlu0 %v1234_v51  ;;  %1232 = vadd.xlane.f32.xlu1 %v1231_v52 }
 0x42b   : > { %2115 = vmatpush3.bf16.msra.mxu1 %v2165_v38 }
 0x42c   : > { %v2674_v53 = vpop.eup %2178 }
 0x42d   : > { %v2181_v54 = vpop.eup %2180  ;;  %v1240_v9 = vsel %vm1173_vm10, %v2674_v53, 0.0 }
 0x42e   : > { %1241 = vadd.xlane.f32.xlu0 %v1240_v9  ;;  %v1237_v55 = vsel %vm1173_vm10, %v2181_v54, 0.0 }
 0x42f   : > { %1238 = vadd.xlane.f32.xlu1 %v1237_v55 }
 0x430   : > { %v2183_v56 = vpop.eup %2182 }
 0x431   : > { %v1243_v10 = vsel %vm1173_vm10, %v2183_v56, 0.0 }
 0x433   : > { %1244 = vadd.xlane.f32.xlu1 %v1243_v10 }
 0x4ab   : > { %v1224_v61 = vpop.xlane.xlu0 %1223 }
 0x4ac   : > { %2184 = vrcp.f32 %v1224_v61 }
 0x4af   : > { %v1230_v62 = vpop.xlane.xlu0 %1229  ;;  %v1227_v63 = vpop.xlane.xlu1 %1226 }
 0x4b0   : > { %2186 = vrcp.f32 %v1227_v63 }
 0x4b1   : > { %2188 = vrcp.f32 %v1230_v62 }
 0x4b3   : > { %v1236_v0 = vpop.xlane.xlu0 %1235  ;;  %v1233_v3 = vpop.xlane.xlu1 %1232 }
 0x4b4   : > { %2190 = vrcp.f32 %v1233_v3 }
 0x4b5   : > { %2192 = vrcp.f32 %v1236_v0 }
 0x4b7   : > { %v1242_v4 = vpop.xlane.xlu0 %1241 }
 0x4b8   : > { %v1239_v6 = vpop.xlane.xlu1 %1238 }
 0x4b9   : > { %2194 = vrcp.f32 %v1239_v6  ;;  %v2185_v7 = vpop.eup %2184 }
 0x4ba   : > { %2196 = vrcp.f32 %v1242_v4  ;;  %v1254_v15 = vmul.f32 %v2185_v7, %v2663_v42 }
 0x4bc   : > { %v1245_v14 = vpop.xlane.xlu1 %1244 }
 0x4bd   : > { %2198 = vrcp.f32 %v1245_v14  ;;  %v2187_v1 = vpop.eup %2186 }
 0x4be   : > { %v1255_v16 = vmul.f32 %v2187_v1, %v2173_v46  ;;  %v2189_v17 = vpop.eup %2188 }
 0x4bf   : > { %v1256_v21 = vmul.f32 %v2189_v17, %v2667_v45 }
 0x4c0   : > { %v1262_v18 = vpack.c.bf16 %v1255_v16, %v1254_v15 }
 0x4c1   : > { %v2191_v20 = vpop.eup %2190 }
 0x4c2   : > { %v1257_v22 = vmul.f32 %v2191_v20, %v2175_v49  ;;  %2092 = vmatprep.mubr.msk.bf16.mxu0 %vm1173_vm10, %v1262_v18  ;;  %v2193_v24 = vpop.eup %2192 }
 0x4c3   : > { %v1258_v27 = vmul.f32 %v2193_v24, %v2177_v50 }
 0x4c4   : > { %v1263_v25 = vpack.c.bf16 %v1257_v22, %v1256_v21 }
 0x4c6   : > { %v2195_v26 = vpop.eup %2194  ;;  %2093 = vmatmul.mubr.msk.bf16.vlgmr.msra.gmra.mxu0 %vm1173_vm10, %v1263_v25 }
 0x4c7   : > { %v1259_v29 = vmul.f32 %v2195_v26, %v2181_v54  ;;  %v2197_v30 = vpop.eup %2196 }
 0x4c8   : > { %v1260_v34 = vmul.f32 %v2197_v30, %v2674_v53 }
 0x4c9   : > { %v1264_v31 = vpack.c.bf16 %v1259_v29, %v1258_v27 }
 0x4ca   : > { %v2199_v32 = vpop.eup %2198 }
 0x4cb   : > { %2096 = vmatprep.mubr.msk.bf16.mxu0 %vm1173_vm10, %v1264_v31  ;;  %v1261_v35 = vmul.f32 %v2199_v32, %v2183_v56 }
 0x4cd   : > { %v1265_v36 = vpack.c.bf16 %v1261_v35, %v1260_v34 }
 0x4cf   : > { %2097 = vmatmul.mubr.msk.bf16.gmra.mxu0 %vm1173_vm10, %v1265_v36 }
 0x586   : > { %v2094_v39 = vpop.f32.mrf.mxu0 }
 0x588   : > { %v1316_v40 = vpop.f32.mrf.mxu0 }
 0x58a   : > { %v2095_v41 = vpop.f32.mrf.mxu0 }
 0x58b   : > { %v1348_v44 = vpack.c.bf16 %v2095_v41, %v2094_v39 }
 0x58c   : > { %v1319_v42 = vpop.f32.mrf.mxu0 }
 0x58d   : > { %v1347_v43 = vpack.c.bf16 %v1319_v42, %v1316_v40 }
 0x58f   : > { %v2098_v45 = vpop.f32.mrf.mxu0  ;;  %2116 = vmatprep.mubr.bf16.mxu1 %v1347_v43 }
 0x590   : > { %2117 = vmatmul.mubr.bf16.vlgmr.msra.gmra.mxu1 %v1348_v44 }
 0x591   : > { %v1332_v46 = vpop.f32.mrf.mxu0 }
 0x593   : > { %v2099_v47 = vpop.f32.mrf.mxu0 }
 0x594   : > { %v1350_v50 = vpack.c.bf16 %v2099_v47, %v2098_v45 }
 0x595   : > { %v1335_v48 = vpop.f32.mrf.mxu0 }
 0x596   : > { %v1349_v49 = vpack.c.bf16 %v1335_v48, %v1332_v46 }
 0x598   : > { %2120 = vmatprep.mubr.bf16.mxu1 %v1349_v49 }
 0x599   : > { %2121 = vmatmul.mubr.bf16.gmra.mxu1 %v1350_v50 }
 0x650   : > { %v2118_v51 = vpop.f32.mrf.mxu1 }
 0x651   : > { %v1482_v54 = vadd.f32 %v2118_v51, %v2616_v59 }
 0x652   : > { %v1449_v52 = vpop.f32.mrf.mxu1 }
 0x653   : > { %v1480_v56 = vadd.f32 %v1449_v52, %v2610_v58 }
 0x654   : > { %v2119_v53 = vpop.f32.mrf.mxu1 }
 0x655   : > { %v1483_v9 = vadd.f32 %v2119_v53, %v2618_v60 }
 0x656   : > { %v1452_v55 = vpop.f32.mrf.mxu1 }
 0x657   : > { %v1706_v10 = vpack.c.bf16 %v1483_v9, %v1482_v54  ;;  %v1481_v57 = vadd.f32 %v1452_v55, %v2612_v28 }
 0x659   : > { %v2122_v11 = vpop.f32.mrf.mxu1  ;;  %1721 = vst [vmem:[%s251_s17 + $0x8] sm:$0xff] %v1706_v10   ;;  %v1701_v13 = vpack.c.bf16 %v1481_v57, %v1480_v56 }
 0x65a   : > { %v1486_v59 = vadd.f32 %v2122_v11, %v2634_v8 }
 0x65b   : > { %v1465_v19 = vpop.f32.mrf.mxu1  ;;  %1702 = vst [vmem:[%s251_s17] sm:$0xff] %v1701_v13  }
 0x65c   : > { %v1484_v61 = vadd.f32 %v1465_v19, %v2625_v2 }
 0x65d   : > { %v2123_v23 = vpop.f32.mrf.mxu1 }
 0x65e   : > { %v1487_v60 = vadd.f32 %v2123_v23, %v2636_v12 }
 0x65f   : > { %v1468_v33 = vpop.f32.mrf.mxu1 }
 0x660   : > { %v1716_v62 = vpack.c.bf16 %v1487_v60, %v1486_v59  ;;  %v1485_v63 = vadd.f32 %v1468_v33, %v2627_v5 }
 0x662   : > { %1723 = vst [vmem:[%s251_s17 + $0x18] sm:$0xff] %v1716_v62   ;;  %v1711_v58 = vpack.c.bf16 %v1485_v63, %v1484_v61 }
 0x664   : > { %1722 = vst [vmem:[%s251_s17 + $0x10] sm:$0xff] %v1711_v58  }
 0x665 PF: > { %s16_s21 = sadd.s32 1, %s2206_s21  }
 0x666   : > { %p13_p4 = scmp.ge.s32.totalorder %s16_s21, 6  }
 0x668   :  { %15 = sbr.rel (!%p13_p4) target bundleno = 1 (0x1), region = 74 }

// kernel: gan_cmp_d_forward.8
= control target key start
LH: loop header
LB: loop body
LE: loop exit
PB: predicated region body
PF: predicated region fallthrough
CT: control target
= control target key end

     0   :  { %s543_s1 = inlined_call_operand.vmem [shape: bf16[256,128], index: 1, kind: input, shape index: {}]   ;;  %s544_s0 = inlined_call_operand.vmem [shape: bf16[64,256], index: 0, kind: input, shape index: {}]   ;;  %s545_s2 = inlined_call_operand.vmem [shape: bf16[64,128], index: 2, kind: output, shape index: {}]  }
   0x1   :  { %v416_v0 = vld [vmem:[%s543_s1 + $0x78] sm:$0xff]   ;;  %v418_v2 = vld [vmem:[%s543_s1 + $0x70] sm:$0xff]   ;;  %v420_v4 = vld [vmem:[%s543_s1 + $0x68] sm:$0xff]  }
   0x2   :  { %v417_v1 = vld [vmem:[%s543_s1 + $0x38] sm:$0xff]   ;;  %360 = vmatprep.subr.bf16.mxu0 %v416_v0  ;;  %400 = vmatprep.subr.bf16.mxu1 %v416_v0  ;;  %v419_v3 = vld [vmem:[%s543_s1 + $0x30] sm:$0xff]   ;;  %v421_v5 = vld [vmem:[%s543_s1 + $0x28] sm:$0xff]  }
   0x3   :  { %361 = vmatpush3.bf16.msra.mxu0 %v417_v1  ;;  %408 = vmatpush3.bf16.msra.mxu1 %v417_v1  ;;  %v422_v6 = vld [vmem:[%s543_s1 + $0x60] sm:$0xff]   ;;  %v424_v8 = vld [vmem:[%s543_s1 + $0x58] sm:$0xff]   ;;  %v426_v10 = vld [vmem:[%s543_s1 + $0x50] sm:$0xff]  }
   0x4   :  { %362 = vmatprep.subr.bf16.mxu0 %v418_v2  ;;  %401 = vmatprep.subr.bf16.mxu1 %v418_v2  ;;  %v423_v7 = vld [vmem:[%s543_s1 + $0x20] sm:$0xff]   ;;  %v425_v9 = vld [vmem:[%s543_s1 + $0x18] sm:$0xff]   ;;  %v427_v13 = vld [vmem:[%s543_s1 + $0x10] sm:$0xff]  }
   0x5   :  { %v434_v11 = vld [vmem:[%s544_s0 + $0x4] ss:$8 sps:$4 sm:$0xff]   ;;  %v432_v18 = vld [vmem:[%s544_s0] ss:$8 sps:$4 sm:$0xff]   ;;  %v438_v20 = vld [vmem:[%s544_s0 + $0x14] ss:$8 sps:$4 sm:$0xff]  }
   0x6   :  { %v437_v12 = vld [vmem:[%s544_s0 + $0x24] ss:$8 sps:$4 sm:$0xff]   ;;  %220 = vmatprep.mubr.bf16.mxu0 %v434_v11  ;;  %v435_v19 = vld [vmem:[%s544_s0 + $0x20] ss:$8 sps:$4 sm:$0xff]   ;;  %v440_v21 = vld [vmem:[%s544_s0 + $0x34] ss:$8 sps:$4 sm:$0xff]  }
   0x7   :  { %363 = vmatpush3.bf16.msra.mxu0 %v419_v3  ;;  %409 = vmatpush3.bf16.msra.mxu1 %v419_v3  ;;  %v428_v14 = vld [vmem:[%s543_s1 + $0x48] sm:$0xff]   ;;  %v430_v16 = vld [vmem:[%s543_s1 + $0x40] sm:$0xff]   ;;  %v442_v22 = vld [vmem:[%s544_s0 + $0x10] ss:$8 sps:$4 sm:$0xff]  }
   0x8   :  { %364 = vmatprep.subr.bf16.mxu0 %v420_v4  ;;  %402 = vmatprep.subr.bf16.mxu1 %v420_v4  ;;  %v429_v15 = vld [vmem:[%s543_s1 + $0x8] sm:$0xff]   ;;  %v431_v17 = vld [vmem:[%s543_s1] sm:$0xff]   ;;  %v443_v23 = vld [vmem:[%s544_s0 + $0x30] ss:$8 sps:$4 sm:$0xff]  }
   0x9   :  { %236 = vmatprep.mubr.bf16.mxu1 %v437_v12 }
   0xb   :  { %365 = vmatpush3.bf16.msra.mxu0 %v421_v5  ;;  %410 = vmatpush3.bf16.msra.mxu1 %v421_v5 }
   0xc   :  { %366 = vmatprep.subr.bf16.mxu0 %v422_v6  ;;  %403 = vmatprep.subr.bf16.mxu1 %v422_v6 }
   0xf   :  { %367 = vmatpush3.bf16.msra.mxu0 %v423_v7  ;;  %411 = vmatpush3.bf16.msra.mxu1 %v423_v7 }
  0x10   :  { %368 = vmatprep.subr.bf16.mxu0 %v424_v8  ;;  %404 = vmatprep.subr.bf16.mxu1 %v424_v8 }
  0x13   :  { %369 = vmatpush3.bf16.msra.mxu0 %v425_v9  ;;  %412 = vmatpush3.bf16.msra.mxu1 %v425_v9 }
  0x14   :  { %370 = vmatprep.subr.bf16.mxu0 %v426_v10  ;;  %405 = vmatprep.subr.bf16.mxu1 %v426_v10 }
  0x17   :  { %371 = vmatpush3.bf16.msra.mxu0 %v427_v13  ;;  %413 = vmatpush3.bf16.msra.mxu1 %v427_v13 }
  0x18   :  { %372 = vmatprep.subr.bf16.mxu0 %v428_v14  ;;  %406 = vmatprep.subr.bf16.mxu1 %v428_v14 }
  0x1b   :  { %373 = vmatpush3.bf16.msra.mxu0 %v429_v15  ;;  %414 = vmatpush3.bf16.msra.mxu1 %v429_v15 }
  0x1c   :  { %374 = vmatprep.subr.bf16.mxu0 %v430_v16  ;;  %407 = vmatprep.subr.bf16.mxu1 %v430_v16 }
  0x1f   :  { %375 = vmatpush3.bf16.msra.mxu0 %v431_v17  ;;  %415 = vmatpush3.bf16.msra.mxu1 %v431_v17 }
  0x22   :  { %221 = vmatmul.mubr.bf16.vlgmr.msra.gmra.mxu0 %v432_v18  ;;  %237 = vmatmul.mubr.bf16.vlgmr.msra.gmra.mxu1 %v435_v19 }
  0x23   :  { %228 = vmatprep.mubr.bf16.mxu0 %v438_v20  ;;  %244 = vmatprep.mubr.bf16.mxu1 %v440_v21 }
  0x2a   :  { %229 = vmatmul.mubr.bf16.gmra.mxu0 %v442_v22  ;;  %245 = vmatmul.mubr.bf16.gmra.mxu1 %v443_v23 }
  0xe2   :  { %v376_v24 = vpop.f32.mrf.mxu0  ;;  %v388_v25 = vpop.f32.mrf.mxu1 }
  0xe4   :  { %v377_v26 = vpop.f32.mrf.mxu0  ;;  %v389_v27 = vpop.f32.mrf.mxu1 }
  0xe5   :  { %v378_v32 = vadd.f32 %v377_v26, %v376_v24  ;;  %v390_v33 = vadd.f32 %v389_v27, %v388_v25 }
  0xe6   :  { %v379_v28 = vpop.f32.mrf.mxu0  ;;  %v391_v29 = vpop.f32.mrf.mxu1 }
  0xe8   :  { %v380_v30 = vpop.f32.mrf.mxu0  ;;  %v392_v31 = vpop.f32.mrf.mxu1 }
  0xe9   :  { %v381_v34 = vadd.f32 %v380_v30, %v379_v28  ;;  %v393_v35 = vadd.f32 %v392_v31, %v391_v29 }
  0xea   :  { %v382_v36 = vpop.f32.mrf.mxu0  ;;  %v394_v37 = vpop.f32.mrf.mxu1 }
  0xeb   :  { %v340_v38 = vpack.c.bf16 %v381_v34, %v378_v32  ;;  %v350_v39 = vpack.c.bf16 %v393_v35, %v390_v33 }
  0xec   :  { %v383_v40 = vpop.f32.mrf.mxu0  ;;  %v395_v41 = vpop.f32.mrf.mxu1 }
  0xed   :  { %341 = vst [vmem:[%s545_s2] sm:$0xff] %v340_v38   ;;  %358 = vst [vmem:[%s545_s2 + $0x10] sm:$0xff] %v350_v39   ;;  %v384_v46 = vadd.f32 %v383_v40, %v382_v36  ;;  %v396_v47 = vadd.f32 %v395_v41, %v394_v37 }
  0xee   :  { %v385_v42 = vpop.f32.mrf.mxu0  ;;  %v397_v43 = vpop.f32.mrf.mxu1 }
  0xf0   :  { %v386_v44 = vpop.f32.mrf.mxu0  ;;  %v398_v45 = vpop.f32.mrf.mxu1 }
  0xf1   :  { %v387_v48 = vadd.f32 %v386_v44, %v385_v42  ;;  %v399_v49 = vadd.f32 %v398_v45, %v397_v43 }
  0xf3   :  { %v345_v50 = vpack.c.bf16 %v387_v48, %v384_v46  ;;  %v355_v51 = vpack.c.bf16 %v399_v49, %v396_v47 }
  0xf5   :  { %357 = vst [vmem:[%s545_s2 + $0x8] sm:$0xff] %v345_v50   ;;  %359 = vst [vmem:[%s545_s2 + $0x18] sm:$0xff] %v355_v51  }

// kernel: gan_cmp_d_forward.9
= control target key start
LH: loop header
LB: loop body
LE: loop exit
PB: predicated region body
PF: predicated region fallthrough
CT: control target
= control target key end

     0   :  { %s920_s12 = smov 0   ;;  %s1205_s0 = inlined_call_operand.vmem [shape: bf16[4,16,128], index: 0, kind: input, shape index: {}]   ;;  %s1206_s1 = inlined_call_operand.vmem [shape: f32[128,8], index: 1, kind: input, shape index: {}]   ;;  %s1207_s2 = inlined_call_operand.vmem [shape: f32[16,128], index: 2, kind: input, shape index: {}]   ;;  %s1208_s3 = inlined_call_operand.vmem [shape: f32[4,1,128], index: 3, kind: output, shape index: {}]  }
   0x1 LB: > { %s622_s13 = sadd.s32 4294967295, %s896_s12   ;;  %p626_p0 = scmp.ge.s32.totalorder %s896_s12, 1  ;;  %s896_s12 = sphi %s920_s12, %s13_s12  }
   0x2   : > { %p137_p1 = scmp.lt.s32.totalorder %s896_s12, 5 }
   0x4   : > { %p138_p2 = pnand %p626_p0, %p137_p1 }
   0x5   : > { %p159_p3 = scmp.lt.s32.totalorder (!%p138_p2), %s622_s13, 3 }
   0x6   : > { %141 = sbr.rel (%p138_p2) target bundleno = 479 (0x1df), region = 32 }
   0xb   : > { %v931_v0 = vld [vmem:[%s1206_s1 + $0x78] sm:$0xff]  ;;  %v898_v1 = vmov 0.0   ;;  %v938_v2 = vld [vmem:[%s1206_s1 + $0x70] sm:$0xff]  ;;  %s1210_s13 = smov (!%p159_p3, %s622_s13), 3  ;;  %v949_v3 = vld [vmem:[%s1206_s1 + $0x68] sm:$0xff]  ;;  %vm899_vm0 = vmmov 0   ;;  %v545_v49 = vlaneseq }
   0xc   : > { %738 = vmatprep.subr.mxu0 %v898_v1  ;;  %773 = vmatprep.subr.mxu1 %v898_v1  ;;  %s665_s20 = sshll.u32 %s1210_s13, 3  ;;  %v959_v4 = vld [vmem:[%s1206_s1 + $0x60] sm:$0xff]  ;;  %v971_v6 = vld [vmem:[%s1206_s1 + $0x58] sm:$0xff]  ;;  %v984_v9 = vld [vmem:[%s1206_s1 + $0x50] sm:$0xff]  ;;  %vm350_vm1 = vcmask 64512   ;;  %s166_s4 = scalar_lea.vmem %s1208_s3, %s1210_s13 }
   0xd   : > { %739 = vmatpush3.msra.mxu0 %v931_v0  ;;  %774 = vmatpush3.msra.mxu1 %v931_v0  ;;  %s163_s25 = scalar_lea.vmem %s1205_s0, %s665_s20  ;;  %v999_v13 = vld [vmem:[%s1206_s1 + $0x48] sm:$0xff]  ;;  %v1008_v16 = vld [vmem:[%s1206_s1 + $0x40] sm:$0xff]  ;;  %v1017_v19 = vld [vmem:[%s1206_s1 + $0x38] sm:$0xff]  ;;  %v546_v50 = vshrl.u32 %v545_v49, 7 }
   0xe   : > { %740 = vmatprep.subr.mxu0 %v898_v1  ;;  %775 = vmatprep.subr.mxu1 %v898_v1  ;;  %v667_v5 = vld [vmem:[%s163_s25] sm:$0xff]   ;;  %v1026_v21 = vld [vmem:[%s1206_s1 + $0x30] sm:$0xff]  ;;  %v1035_v24 = vld [vmem:[%s1206_s1 + $0x28] sm:$0xff] }
   0xf   : > { %741 = vmatpush3.msra.mxu0 %v938_v2  ;;  %776 = vmatpush3.msra.mxu1 %v938_v2  ;;  %v973_v7 = vunpack.c.l.bf16 %v667_v5  ;;  %v975_v8 = vunpack.c.h.bf16 %v667_v5  ;;  %v1044_v25 = vld [vmem:[%s1206_s1 + $0x20] sm:$0xff]  ;;  %v1053_v28 = vld [vmem:[%s1206_s1 + $0x18] sm:$0xff]  ;;  %v1062_v29 = vld [vmem:[%s1206_s1 + $0x10] sm:$0xff]  ;;  %v547_v51 = vsub.s32 0, %v546_v50 }
  0x10   : > { %742 = vmatprep.subr.mxu0 %v898_v1  ;;  %777 = vmatprep.subr.mxu1 %v898_v1  ;;  %v1071_v32 = vld [vmem:[%s1206_s1 + $0x8] sm:$0xff]  ;;  %v1080_v33 = vld [vmem:[%s1206_s1] sm:$0xff] }
  0x11   : > { %743 = vmatpush3.msra.mxu0 %v949_v3  ;;  %778 = vmatpush3.msra.mxu1 %v949_v3  ;;  %v187_v10 = vadd.f32 %v975_v8, %v973_v7  ;;  %v194_v11 = vmul.f32 %v973_v7, %v973_v7  ;;  %v195_v12 = vmul.f32 %v975_v8, %v975_v8  ;;  %v563_v60 = vld [vmem:[%s1207_s2] sm:$0xff]  ;;  %v564_v61 = vld [vmem:[%s1207_s2 + $0x8] sm:$0xff] }
  0x12   : > { %744 = vmatprep.subr.mxu0 %v898_v1  ;;  %779 = vmatprep.subr.mxu1 %v898_v1 }
  0x13   : > { %745 = vmatpush3.msra.mxu0 %v959_v4  ;;  %780 = vmatpush3.msra.mxu1 %v959_v4  ;;  %v188_v14 = vrot.slane %v187_v10, 4  ;;  %v196_v15 = vadd.f32 %v195_v12, %v194_v11 }
  0x14   : > { %746 = vmatprep.subr.mxu0 %v898_v1  ;;  %781 = vmatprep.subr.mxu1 %v898_v1 }
  0x15   : > { %747 = vmatpush3.msra.mxu0 %v971_v6  ;;  %782 = vmatpush3.msra.mxu1 %v971_v6  ;;  %v197_v17 = vrot.slane %v196_v15, 4  ;;  %v189_v18 = vadd.f32 %v188_v14, %v187_v10 }
  0x16   : > { %748 = vmatprep.subr.mxu0 %v898_v1  ;;  %783 = vmatprep.subr.mxu1 %v898_v1 }
  0x17   : > { %749 = vmatpush3.msra.mxu0 %v984_v9  ;;  %784 = vmatpush3.msra.mxu1 %v984_v9  ;;  %v198_v20 = vadd.f32 %v197_v17, %v196_v15  ;;  %v190_v22 = vrot.slane %v189_v18, 2 }
  0x18   : > { %750 = vmatprep.subr.mxu0 %v898_v1  ;;  %785 = vmatprep.subr.mxu1 %v898_v1 }
  0x19   : > { %751 = vmatpush3.msra.mxu0 %v999_v13  ;;  %786 = vmatpush3.msra.mxu1 %v999_v13  ;;  %v199_v23 = vrot.slane %v198_v20, 2  ;;  %v191_v26 = vadd.f32 %v190_v22, %v189_v18 }
  0x1a   : > { %752 = vmatprep.subr.mxu0 %v898_v1  ;;  %787 = vmatprep.subr.mxu1 %v898_v1 }
  0x1b   : > { %753 = vmatpush3.msra.mxu0 %v1008_v16  ;;  %788 = vmatpush3.msra.mxu1 %v1008_v16  ;;  %v200_v27 = vadd.f32 %v199_v23, %v198_v20  ;;  %v192_v30 = vrot.slane %v191_v26, 1 }
  0x1c   : > { %754 = vmatprep.subr.mxu0 %v898_v1  ;;  %789 = vmatprep.subr.mxu1 %v898_v1 }
  0x1d   : > { %755 = vmatpush3.msra.mxu0 %v1017_v19  ;;  %790 = vmatpush3.msra.mxu1 %v1017_v19  ;;  %v201_v31 = vrot.slane %v200_v27, 1  ;;  %v193_v34 = vadd.f32 %v192_v30, %v191_v26 }
  0x1e   : > { %756 = vmatprep.subr.mxu0 %v898_v1  ;;  %791 = vmatprep.subr.mxu1 %v898_v1 }
  0x1f   : > { %757 = vmatpush3.msra.mxu0 %v1026_v21  ;;  %792 = vmatpush3.msra.mxu1 %v1026_v21  ;;  %v202_v35 = vadd.f32 %v201_v31, %v200_v27 }
  0x20   : > { %758 = vmatprep.subr.mxu0 %v898_v1  ;;  %793 = vmatprep.subr.mxu1 %v898_v1 }
  0x21   : > { %759 = vmatpush3.msra.mxu0 %v1035_v24  ;;  %794 = vmatpush3.msra.mxu1 %v1035_v24 }
  0x22   : > { %760 = vmatprep.subr.mxu0 %v898_v1  ;;  %795 = vmatprep.subr.mxu1 %v898_v1 }
  0x23   : > { %761 = vmatpush3.msra.mxu0 %v1044_v25  ;;  %796 = vmatpush3.msra.mxu1 %v1044_v25 }
  0x24   : > { %762 = vmatprep.subr.mxu0 %v898_v1  ;;  %797 = vmatprep.subr.mxu1 %v898_v1 }
  0x25   : > { %763 = vmatpush3.msra.mxu0 %v1053_v28  ;;  %798 = vmatpush3.msra.mxu1 %v1053_v28 }
  0x26   : > { %764 = vmatprep.subr.mxu0 %v898_v1  ;;  %799 = vmatprep.subr.mxu1 %v898_v1 }
  0x27   : > { %765 = vmatpush3.msra.mxu0 %v1062_v29  ;;  %800 = vmatpush3.msra.mxu1 %v1062_v29 }
  0x28   : > { %766 = vmatprep.subr.mxu0 %v898_v1  ;;  %801 = vmatprep.subr.mxu1 %v898_v1 }
  0x29   : > { %767 = vmatpush3.msra.mxu0 %v1071_v32  ;;  %802 = vmatpush3.msra.mxu1 %v1071_v32 }
  0x2a   : > { %768 = vmatprep.subr.mxu0 %v898_v1  ;;  %803 = vmatprep.subr.mxu1 %v898_v1 }
  0x2b   : > { %769 = vmatpush3.msra.mxu0 %v1080_v33  ;;  %770 = vmatprep.mubr.msk.f32.mxu0 %vm899_vm0, %v898_v1 }
  0x2c   : > { %804 = vmatpush3.msra.mxu1 %v1080_v33  ;;  %805 = vmatprep.mubr.msk.f32.mxu1 %vm899_vm0, %v898_v1 }
  0x2d   : > { %771 = vmatmul.mubr.f32.vlgmr.msra.gmra.mxu0 %v193_v34  ;;  %806 = vmatmul.mubr.f32.vlgmr.msra.gmra.mxu1 %v202_v35 }
  0x2e   : > { %808 = vmatprep.subr.mxu0 %v898_v1  ;;  %843 = vmatprep.subr.mxu1 %v898_v1 }
  0x2f   : > { %809 = vmatpush3.xpose.msk.msra.mxu0 %vm350_vm1, %v931_v0  ;;  %844 = vmatpush3.xpose.msk.msra.mxu1 %vm350_vm1, %v931_v0 }
  0x30   : > { %810 = vmatprep.subr.mxu0 %v898_v1  ;;  %845 = vmatprep.subr.mxu1 %v898_v1 }
  0x31   : > { %840 = vmatprep.mubr.msk.f32.mxu0 %vm899_vm0, %v898_v1  ;;  %875 = vmatprep.mubr.msk.f32.mxu1 %vm899_vm0, %v898_v1 }
  0x33   : > { %811 = vmatpush3.xpose.msk.msra.mxu0 %vm350_vm1, %v938_v2  ;;  %846 = vmatpush3.xpose.msk.msra.mxu1 %vm350_vm1, %v938_v2 }
  0x34   : > { %812 = vmatprep.subr.mxu0 %v898_v1  ;;  %847 = vmatprep.subr.mxu1 %v898_v1 }
  0x37   : > { %813 = vmatpush3.xpose.msk.msra.mxu0 %vm350_vm1, %v949_v3  ;;  %848 = vmatpush3.xpose.msk.msra.mxu1 %vm350_vm1, %v949_v3 }
  0x38   : > { %814 = vmatprep.subr.mxu0 %v898_v1  ;;  %849 = vmatprep.subr.mxu1 %v898_v1 }
  0x3b   : > { %815 = vmatpush3.xpose.msk.msra.mxu0 %vm350_vm1, %v959_v4  ;;  %850 = vmatpush3.xpose.msk.msra.mxu1 %vm350_vm1, %v959_v4 }
  0x3c   : > { %816 = vmatprep.subr.mxu0 %v898_v1  ;;  %851 = vmatprep.subr.mxu1 %v898_v1 }
  0x3f   : > { %817 = vmatpush3.xpose.msk.msra.mxu0 %vm350_vm1, %v971_v6  ;;  %852 = vmatpush3.xpose.msk.msra.mxu1 %vm350_vm1, %v971_v6 }
  0x40   : > { %818 = vmatprep.subr.mxu0 %v898_v1  ;;  %853 = vmatprep.subr.mxu1 %v898_v1 }
  0x43   : > { %819 = vmatpush3.xpose.msk.msra.mxu0 %vm350_vm1, %v984_v9  ;;  %854 = vmatpush3.xpose.msk.msra.mxu1 %vm350_vm1, %v984_v9 }
  0x44   : > { %820 = vmatprep.subr.mxu0 %v898_v1  ;;  %855 = vmatprep.subr.mxu1 %v898_v1 }
  0x47   : > { %821 = vmatpush3.xpose.msk.msra.mxu0 %vm350_vm1, %v999_v13  ;;  %856 = vmatpush3.xpose.msk.msra.mxu1 %vm350_vm1, %v999_v13 }
  0x48   : > { %822 = vmatprep.subr.mxu0 %v898_v1  ;;  %857 = vmatprep.subr.mxu1 %v898_v1 }
  0x4b   : > { %823 = vmatpush3.xpose.msk.msra.mxu0 %vm350_vm1, %v1008_v16  ;;  %858 = vmatpush3.xpose.msk.msra.mxu1 %vm350_vm1, %v1008_v16 }
  0x4c   : > { %824 = vmatprep.subr.mxu0 %v898_v1  ;;  %859 = vmatprep.subr.mxu1 %v898_v1 }
  0x4f   : > { %825 = vmatpush3.xpose.msk.msra.mxu0 %vm350_vm1, %v1017_v19  ;;  %860 = vmatpush3.xpose.msk.msra.mxu1 %vm350_vm1, %v1017_v19 }
  0x50   : > { %826 = vmatprep.subr.mxu0 %v898_v1  ;;  %861 = vmatprep.subr.mxu1 %v898_v1 }
  0x53   : > { %827 = vmatpush3.xpose.msk.msra.mxu0 %vm350_vm1, %v1026_v21  ;;  %862 = vmatpush3.xpose.msk.msra.mxu1 %vm350_vm1, %v1026_v21 }
  0x54   : > { %828 = vmatprep.subr.mxu0 %v898_v1  ;;  %863 = vmatprep.subr.mxu1 %v898_v1 }
  0x57   : > { %829 = vmatpush3.xpose.msk.msra.mxu0 %vm350_vm1, %v1035_v24  ;;  %864 = vmatpush3.xpose.msk.msra.mxu1 %vm350_vm1, %v1035_v24 }
  0x58   : > { %830 = vmatprep.subr.mxu0 %v898_v1  ;;  %865 = vmatprep.subr.mxu1 %v898_v1 }
  0x5b   : > { %831 = vmatpush3.xpose.msk.msra.mxu0 %vm350_vm1, %v1044_v25  ;;  %866 = vmatpush3.xpose.msk.msra.mxu1 %vm350_vm1, %v1044_v25 }
  0x5c   : > { %832 = vmatprep.subr.mxu0 %v898_v1  ;;  %867 = vmatprep.subr.mxu1 %v898_v1 }
  0x5f   : > { %833 = vmatpush3.xpose.msk.msra.mxu0 %vm350_vm1, %v1053_v28  ;;  %868 = vmatpush3.xpose.msk.msra.mxu1 %vm350_vm1, %v1053_v28 }
  0x60   : > { %834 = vmatprep.subr.mxu0 %v898_v1  ;;  %869 = vmatprep.subr.mxu1 %v898_v1 }
  0x63   : > { %835 = vmatpush3.xpose.msk.msra.mxu0 %vm350_vm1, %v1062_v29  ;;  %870 = vmatpush3.xpose.msk.msra.mxu1 %vm350_vm1, %v1062_v29 }
  0x64   : > { %836 = vmatprep.subr.mxu0 %v898_v1  ;;  %871 = vmatprep.subr.mxu1 %v898_v1 }
  0x67   : > { %837 = vmatpush3.xpose.msk.msra.mxu0 %vm350_vm1, %v1071_v32  ;;  %872 = vmatpush3.xpose.msk.msra.mxu1 %vm350_vm1, %v1071_v32 }
  0x68   : > { %838 = vmatprep.subr.mxu0 %v898_v1  ;;  %873 = vmatprep.subr.mxu1 %v898_v1 }
  0x6b   : > { %839 = vmatpush3.xpose.msk.msra.mxu0 %vm350_vm1, %v1080_v33  ;;  %874 = vmatpush3.xpose.msk.msra.mxu1 %vm350_vm1, %v1080_v33 }
  0xed   : > { %v269_v36 = vpop.f32.mrf.mxu0  ;;  %v340_v37 = vpop.f32.mrf.mxu1 }
  0xee   : > { %v273_v38 = vmul.f32 0.015625, %v269_v36  ;;  %v344_v39 = vmul.f32 0.015625, %v340_v37 }
  0xef   : > { %v772_v40 = vpop.f32.mrf.mxu0  ;;  %v807_v41 = vpop.f32.mrf.mxu1 }
  0xf0   : > { %v345_v42 = vmul.f32 %v273_v38, %v273_v38  ;;  %841 = vmatmul.mubr.msk.f32.vlgmr.msra.gmra.mxu0 %vm350_vm1, %v273_v38 }
  0xf2   : > { %v346_v43 = vsub.f32 %v344_v39, %v345_v42 }
  0xf4   : > { %v347_v44 = vmax.f32 %v346_v43, 0.0 }
  0xf6   : > { %v348_v45 = vadd.f32 1e-05, %v347_v44 }
  0xf8   : > { %888 = vrsqrt.f32 %v348_v45 }
 0x105   : > { %v889_v46 = vpop.eup %888 }
 0x106   : > { %876 = vmatmul.mubr.msk.f32.vlgmr.msra.gmra.mxu1 %vm350_vm1, %v889_v46 }
 0x1b0   : > { %v468_v47 = vpop.f32.mrf.mxu0 }
 0x1b1   : > { %v548_v52 = vrot.slane %v468_v47, %v547_v51 }
 0x1b2   : > { %v842_v48 = vpop.f32.mrf.mxu0 }
 0x1b3   : > { %v549_v54 = vsub.f32 %v973_v7, %v548_v52  ;;  %v550_v55 = vsub.f32 %v975_v8, %v548_v52 }
 0x1c6   : > { %v541_v53 = vpop.f32.mrf.mxu1 }
 0x1c7   : > { %v554_v56 = vrot.slane %v541_v53, %v547_v51 }
 0x1c8   : > { %v877_v57 = vpop.f32.mrf.mxu1 }
 0x1c9   : > { %v555_v58 = vmul.f32 %v554_v56, %v549_v54  ;;  %v556_v59 = vmul.f32 %v554_v56, %v550_v55 }
 0x1cb   : > { %vm557_vm2 = vcmp.ge.f32.partialorder %v555_v58, 0.0  ;;  %vm558_vm3 = vcmp.ge.f32.partialorder %v556_v59, 0.0  ;;  %v559_v62 = vmul.f32 0.2, %v555_v58  ;;  %v560_v63 = vmul.f32 0.2, %v556_v59 }
 0x1cd   : > { %v561_v0 = vsel %vm557_vm2, %v555_v58, %v559_v62  ;;  %v562_v1 = vsel %vm558_vm3, %v556_v59, %v560_v63 }
 0x1ce   : > { %v565_v2 = vmul.f32 %v563_v60, %v561_v0  ;;  %v566_v3 = vmul.f32 %v564_v61, %v562_v1 }
 0x1d0   : > { %v567_v4 = vadd.f32 %v566_v3, %v565_v2 }
 0x1d2   : > { %v568_v5 = vrot.slane %v567_v4, 4 }
 0x1d4   : > { %v569_v6 = vadd.f32 %v568_v5, %v567_v4 }
 0x1d6   : > { %v570_v7 = vrot.slane %v569_v6, 2 }
 0x1d8   : > { %v571_v8 = vadd.f32 %v570_v7, %v569_v6 }
 0x1da   : > { %v572_v9 = vrot.slane %v571_v8, 1 }
 0x1dc   : > { %v573_v10 = vadd.f32 %v572_v9, %v571_v8 }
 0x1de   : > { %574 = vst [vmem:[%s166_s4] sm:$0x1] %v573_v10 }
 0x1df PF: > { %s13_s12 = sadd.s32 1, %s896_s12  }
 0x1e0   : > { %p10_p4 = scmp.ge.s32.totalorder %s13_s12, 6  }
 0x1e2   :  { %12 = sbr.rel (!%p10_p4) target bundleno = 1 (0x1), region = 62 }

</bundles_post_ra>
